<compile_context>
chip_gen: v6e
topology: v6e:2x2x1
jax: 0.10.0
libtpu: 0.0.40
codegen_flags: <defaults>
</compile_context>

<pallas_src>
import functools

import jax
import jax.numpy as jnp
from jax import lax
from jax.experimental import pallas as pl
from jax.experimental.pallas import tpu as pltpu


def _attn_maxpool_kernel(x_ref, wqk_ref, wp_ref, bp_ref, o_ref, *, num_heads):
    """One batch element per grid step.

    x_ref  : (1, C, N)   tokens, channels on sublanes / sequence on lanes (f32)
    wqk_ref: (2C, C)     stacked [wq * scale; wk] 1x1-conv weights (bf16)
    wp_ref : (Co, C)     proj 1x1-conv weight (f32; only used in a tiny matvec)
    bp_ref : (Co, 1)     proj bias (f32)
    o_ref  : (1, Co, N)  output
    """
    x = x_ref[0]
    C, N = x.shape
    hd = C // num_heads

    # Fused q/k 1x1 convs: single (2C, C) @ (C, N) bf16 MXU matmul, f32 accum.
    # The attention scale is pre-folded into the wq rows by the wrapper.
    x_bf = x.astype(jnp.bfloat16)
    qk = jnp.dot(wqk_ref[...], x_bf, preferred_element_type=jnp.float32)  # (2C, N)
    q = qk[:C, :].astype(jnp.bfloat16)                                    # (C, N)
    k = qk[C:, :].astype(jnp.bfloat16)                                    # (C, N)

    # s[0, i] = sum_h max_j attn[h, i, j].
    # Per head, contract the hd channel rows of k_h and q_h along sublanes
    # (dim 0 of both): attn_t[j, i] = sum_d k[h*hd+d, j] * q_scaled[h*hd+d, i].
    # Keys sit on sublanes, so max over axis 0 is directly a (1, N) lane-dense
    # row matching the (C, N) output orientation — no k.T, no lane slices.
    s = jnp.zeros((1, N), jnp.float32)
    for h in range(num_heads):
        q_h = q[h * hd:(h + 1) * hd, :]                                   # (hd, N)
        k_h = k[h * hd:(h + 1) * hd, :]                                   # (hd, N)
        attn_t = lax.dot_general(
            k_h, q_h, (((0,), (0,)), ((), ())),
            preferred_element_type=jnp.float32)                           # (N_k, N_q)
        s = s + jnp.max(attn_t, axis=0, keepdims=True)                    # (1, N)

    # Rank-1 value path: out_pre[c, i] = xmean[c] * s[i], hence
    #   proj(out_pre) = (wp @ xmean) * s + bp   — a (Co,C)@(C,1) matvec plus a
    # VPU broadcast multiply instead of a full (Co,C)@(C,N) MXU matmul.
    xmean = jnp.mean(x.astype(jnp.float32), axis=-1, keepdims=True)       # (C, 1)
    wpx = jnp.dot(wp_ref[...].astype(jnp.float32), xmean,
                  preferred_element_type=jnp.float32)                     # (Co, 1)
    o = wpx * s + bp_ref[...].astype(jnp.float32)                         # (Co, N)
    o_ref[0] = o.astype(o_ref.dtype)


@functools.partial(jax.jit, static_argnames=("num_heads",))
def attention_maxpool_pallas(x, wq, wk, wp, bp, *, num_heads):
    """x: (B, C, N); wq/wk: (C, C); wp: (Co, C); bp: (Co,). Returns (B, Co, N)."""
    B, C, N = x.shape
    Co = wp.shape[0]
    assert C % num_heads == 0
    scale = (C // num_heads) ** -0.5

    # Fold the softmax scale into wq (max over keys commutes with a positive
    # scale) and stack wq/wk so both 1x1 convs become one 2C-row MXU matmul.
    # Ship the stacked weight as bf16: halves its DMA, matmul accumulates f32.
    w_qk = jnp.concatenate([wq * scale, wk], axis=0).astype(jnp.bfloat16)  # (2C, C)

    kernel = functools.partial(_attn_maxpool_kernel, num_heads=num_heads)
    return pl.pallas_call(
        kernel,
        out_shape=jax.ShapeDtypeStruct((B, Co, N), x.dtype),
        grid_spec=pltpu.PrefetchScalarGridSpec(
            num_scalar_prefetch=0,
            grid=(B,),
            in_specs=[
                pl.BlockSpec((1, C, N), lambda b: (b, 0, 0)),
                pl.BlockSpec((2 * C, C), lambda b: (0, 0)),
                pl.BlockSpec((Co, C), lambda b: (0, 0)),
                pl.BlockSpec((Co, 1), lambda b: (0, 0)),
            ],
            out_specs=pl.BlockSpec((1, Co, N), lambda b: (b, 0, 0)),
        ),
        compiler_params=pltpu.CompilerParams(
            dimension_semantics=("parallel",),
        ),
    )(x, w_qk, wp, bp.reshape(Co, 1))


def attention_maxpool_reference(x, wq, wk, wp, bp, *, num_heads):
    """Pure-JAX (f32) mirror of Attention_MaxPool.forward (sr_ratio=1, qkv_bias=False)."""
    B, C, N = x.shape
    hd = C // num_heads
    scale = hd ** -0.5
    q = jnp.einsum("oc,bcn->bon", wq, x)                          # Conv1d, no bias
    k = jnp.einsum("oc,bcn->bon", wk, x)
    q = q.reshape(B, num_heads, hd, N).transpose(0, 1, 3, 2)      # (B, nh, N, hd)
    k = k.reshape(B, num_heads, hd, N)                            # (B, nh, hd, N)
    v = jnp.swapaxes(
        jnp.tile(jnp.mean(x, axis=2, keepdims=True), (1, 1, num_heads)),
        -2, -1)                                                   # (B, nh, C)
    attn = jnp.einsum("bhid,bhdj->bhij", q, k) * scale            # (B, nh, N, N)
    attn = jnp.max(attn, axis=-1)                                 # (B, nh, N)
    out = jnp.swapaxes(attn, -2, -1) @ v                          # (B, N, C)
    out = jnp.swapaxes(out, -2, -1)                               # (B, C, N)
    out = jnp.einsum("oc,bcn->bon", wp, out) + bp.reshape(1, -1, 1)
    return out


if __name__ == "__main__":
    # Small ViT-style shapes: dim=128 (8 heads, head_dim=16), N = H*W = 128 tokens.
    B, dim, num_heads = 2, 128, 8
    H, W = 8, 16
    N = H * W   # H, W only matter for the (unimplemented) sr_ratio > 1 branch

    key = jax.random.PRNGKey(0)
    kx, kq, kk, kp, kb = jax.random.split(key, 5)

    x = jax.random.normal(kx, (B, dim, N), dtype=jnp.float32)
    # Conv1d(kernel_size=1) weights squeezed to (out, in); ~trunc_normal(0.02) init.
    wq = 0.02 * jax.random.normal(kq, (dim, dim), dtype=jnp.float32)
    wk = 0.02 * jax.random.normal(kk, (dim, dim), dtype=jnp.float32)
    wp = 0.02 * jax.random.normal(kp, (dim, dim), dtype=jnp.float32)
    # Module zero-inits the proj bias; use a small nonzero one to exercise the add.
    bp = 0.01 * jax.random.normal(kb, (dim,), dtype=jnp.float32)

    out = attention_maxpool_pallas(x, wq, wk, wp, bp, num_heads=num_heads)
    out = jax.block_until_ready(out)

    ref = attention_maxpool_reference(x, wq, wk, wp, bp, num_heads=num_heads)
    assert out.shape == (B, dim, N)
    # Tolerance loosened vs. the pure-f32 version: the q/k convs and per-head
    # products now use bf16 MXU operands (f32 accumulation).
    assert jnp.allclose(out, ref, atol=5e-3, rtol=2e-2), \
        float(jnp.max(jnp.abs(out - ref)))

    print("KERNEL_OK")
</pallas_src>

<mosaic_0001>
module attributes {stable_mosaic.version = 11 : i64} {
  func.func @_attn_maxpool_kernel(%arg0: i32, %arg1: memref<1x128x128xf32, #tpu.memory_space<vmem>>, %arg2: memref<256x128xbf16, #tpu.memory_space<vmem>>, %arg3: memref<128x128xf32, #tpu.memory_space<vmem>>, %arg4: memref<128x1xf32, #tpu.memory_space<vmem>>, %arg5: memref<1x128x128xf32, #tpu.memory_space<vmem>>) attributes {dimension_semantics = [#tpu.dimension_semantics<parallel>], iteration_bounds = array<i64: 2>, scalar_prefetch = 0 : i64, scratch_operands = 0 : i64, tpu.core_type = #tpu.core_type<tc>, window_params = [{transform_indices = @transform_0, window_bounds = array<i64: 1, 128, 128>}, {pipeline_mode = #tpu.pipeline_mode<synchronous>, transform_indices = @transform_1, window_bounds = array<i64: 256, 128>}, {pipeline_mode = #tpu.pipeline_mode<synchronous>, transform_indices = @transform_2, window_bounds = array<i64: 128, 128>}, {pipeline_mode = #tpu.pipeline_mode<synchronous>, transform_indices = @transform_3, window_bounds = array<i64: 128, 1>}, {transform_indices = @transform_4, window_bounds = array<i64: 1, 128, 128>}]} {
    %c0 = arith.constant 0 : index
    %c0_0 = arith.constant 0 : index
    %c0_1 = arith.constant 0 : index
    %0 = vector.load %arg1[%c0, %c0_0, %c0_1] : memref<1x128x128xf32, #tpu.memory_space<vmem>>, vector<1x128x128xf32>
    %1 = vector.shape_cast %0 : vector<1x128x128xf32> to vector<128x128xf32>
    %2 = arith.truncf %1 : vector<128x128xf32> to vector<128x128xbf16>
    %c0_2 = arith.constant 0 : index
    %c0_3 = arith.constant 0 : index
    %3 = vector.load %arg2[%c0_2, %c0_3] : memref<256x128xbf16, #tpu.memory_space<vmem>>, vector<256x128xbf16>
    %cst = arith.constant dense<0.000000e+00> : vector<256x128xf32>
    %4 = tpu.matmul %3, %2, %cst {dimension_numbers = #tpu.dot_dimension_numbers<[1], [0], [0], [1], [0, 0, 1, 1], [], []>} : vector<256x128xbf16>, vector<128x128xbf16>, vector<256x128xf32> -> vector<256x128xf32>
    %5 = vector.extract_strided_slice %4 {offsets = [0, 0], sizes = [128, 128], strides = [1, 1]} : vector<256x128xf32> to vector<128x128xf32>
    %6 = arith.truncf %5 : vector<128x128xf32> to vector<128x128xbf16>
    %7 = vector.extract_strided_slice %4 {offsets = [128, 0], sizes = [128, 128], strides = [1, 1]} : vector<256x128xf32> to vector<128x128xf32>
    %8 = arith.truncf %7 : vector<128x128xf32> to vector<128x128xbf16>
    %cst_4 = arith.constant 0.000000e+00 : f32
    %9 = vector.broadcast %cst_4 : f32 to vector<1x128xf32>
    %10 = vector.extract_strided_slice %6 {offsets = [0, 0], sizes = [16, 128], strides = [1, 1]} : vector<128x128xbf16> to vector<16x128xbf16>
    %11 = vector.extract_strided_slice %8 {offsets = [0, 0], sizes = [16, 128], strides = [1, 1]} : vector<128x128xbf16> to vector<16x128xbf16>
    %cst_5 = arith.constant dense<0.000000e+00> : vector<128x128xf32>
    %12 = tpu.matmul %11, %10, %cst_5 {dimension_numbers = #tpu.dot_dimension_numbers<[0], [0], [1], [1], [0, 1, 1, 1], [], []>} : vector<16x128xbf16>, vector<16x128xbf16>, vector<128x128xf32> -> vector<128x128xf32>
    %cst_6 = arith.constant dense<0xFF800000> : vector<128xf32>
    %13 = vector.multi_reduction <maximumf>, %12, %cst_6 [0] : vector<128x128xf32> to vector<128xf32>
    %14 = vector.shape_cast %13 : vector<128xf32> to vector<1x128xf32>
    %15 = arith.addf %9, %14 : vector<1x128xf32>
    %16 = vector.extract_strided_slice %6 {offsets = [16, 0], sizes = [16, 128], strides = [1, 1]} : vector<128x128xbf16> to vector<16x128xbf16>
    %17 = vector.extract_strided_slice %8 {offsets = [16, 0], sizes = [16, 128], strides = [1, 1]} : vector<128x128xbf16> to vector<16x128xbf16>
    %cst_7 = arith.constant dense<0.000000e+00> : vector<128x128xf32>
    %18 = tpu.matmul %17, %16, %cst_7 {dimension_numbers = #tpu.dot_dimension_numbers<[0], [0], [1], [1], [0, 1, 1, 1], [], []>} : vector<16x128xbf16>, vector<16x128xbf16>, vector<128x128xf32> -> vector<128x128xf32>
    %cst_8 = arith.constant dense<0xFF800000> : vector<128xf32>
    %19 = vector.multi_reduction <maximumf>, %18, %cst_8 [0] : vector<128x128xf32> to vector<128xf32>
    %20 = vector.shape_cast %19 : vector<128xf32> to vector<1x128xf32>
    %21 = arith.addf %15, %20 : vector<1x128xf32>
    %22 = vector.extract_strided_slice %6 {offsets = [32, 0], sizes = [16, 128], strides = [1, 1]} : vector<128x128xbf16> to vector<16x128xbf16>
    %23 = vector.extract_strided_slice %8 {offsets = [32, 0], sizes = [16, 128], strides = [1, 1]} : vector<128x128xbf16> to vector<16x128xbf16>
    %cst_9 = arith.constant dense<0.000000e+00> : vector<128x128xf32>
    %24 = tpu.matmul %23, %22, %cst_9 {dimension_numbers = #tpu.dot_dimension_numbers<[0], [0], [1], [1], [0, 1, 1, 1], [], []>} : vector<16x128xbf16>, vector<16x128xbf16>, vector<128x128xf32> -> vector<128x128xf32>
    %cst_10 = arith.constant dense<0xFF800000> : vector<128xf32>
    %25 = vector.multi_reduction <maximumf>, %24, %cst_10 [0] : vector<128x128xf32> to vector<128xf32>
    %26 = vector.shape_cast %25 : vector<128xf32> to vector<1x128xf32>
    %27 = arith.addf %21, %26 : vector<1x128xf32>
    %28 = vector.extract_strided_slice %6 {offsets = [48, 0], sizes = [16, 128], strides = [1, 1]} : vector<128x128xbf16> to vector<16x128xbf16>
    %29 = vector.extract_strided_slice %8 {offsets = [48, 0], sizes = [16, 128], strides = [1, 1]} : vector<128x128xbf16> to vector<16x128xbf16>
    %cst_11 = arith.constant dense<0.000000e+00> : vector<128x128xf32>
    %30 = tpu.matmul %29, %28, %cst_11 {dimension_numbers = #tpu.dot_dimension_numbers<[0], [0], [1], [1], [0, 1, 1, 1], [], []>} : vector<16x128xbf16>, vector<16x128xbf16>, vector<128x128xf32> -> vector<128x128xf32>
    %cst_12 = arith.constant dense<0xFF800000> : vector<128xf32>
    %31 = vector.multi_reduction <maximumf>, %30, %cst_12 [0] : vector<128x128xf32> to vector<128xf32>
    %32 = vector.shape_cast %31 : vector<128xf32> to vector<1x128xf32>
    %33 = arith.addf %27, %32 : vector<1x128xf32>
    %34 = vector.extract_strided_slice %6 {offsets = [64, 0], sizes = [16, 128], strides = [1, 1]} : vector<128x128xbf16> to vector<16x128xbf16>
    %35 = vector.extract_strided_slice %8 {offsets = [64, 0], sizes = [16, 128], strides = [1, 1]} : vector<128x128xbf16> to vector<16x128xbf16>
    %cst_13 = arith.constant dense<0.000000e+00> : vector<128x128xf32>
    %36 = tpu.matmul %35, %34, %cst_13 {dimension_numbers = #tpu.dot_dimension_numbers<[0], [0], [1], [1], [0, 1, 1, 1], [], []>} : vector<16x128xbf16>, vector<16x128xbf16>, vector<128x128xf32> -> vector<128x128xf32>
    %cst_14 = arith.constant dense<0xFF800000> : vector<128xf32>
    %37 = vector.multi_reduction <maximumf>, %36, %cst_14 [0] : vector<128x128xf32> to vector<128xf32>
    %38 = vector.shape_cast %37 : vector<128xf32> to vector<1x128xf32>
    %39 = arith.addf %33, %38 : vector<1x128xf32>
    %40 = vector.extract_strided_slice %6 {offsets = [80, 0], sizes = [16, 128], strides = [1, 1]} : vector<128x128xbf16> to vector<16x128xbf16>
    %41 = vector.extract_strided_slice %8 {offsets = [80, 0], sizes = [16, 128], strides = [1, 1]} : vector<128x128xbf16> to vector<16x128xbf16>
    %cst_15 = arith.constant dense<0.000000e+00> : vector<128x128xf32>
    %42 = tpu.matmul %41, %40, %cst_15 {dimension_numbers = #tpu.dot_dimension_numbers<[0], [0], [1], [1], [0, 1, 1, 1], [], []>} : vector<16x128xbf16>, vector<16x128xbf16>, vector<128x128xf32> -> vector<128x128xf32>
    %cst_16 = arith.constant dense<0xFF800000> : vector<128xf32>
    %43 = vector.multi_reduction <maximumf>, %42, %cst_16 [0] : vector<128x128xf32> to vector<128xf32>
    %44 = vector.shape_cast %43 : vector<128xf32> to vector<1x128xf32>
    %45 = arith.addf %39, %44 : vector<1x128xf32>
    %46 = vector.extract_strided_slice %6 {offsets = [96, 0], sizes = [16, 128], strides = [1, 1]} : vector<128x128xbf16> to vector<16x128xbf16>
    %47 = vector.extract_strided_slice %8 {offsets = [96, 0], sizes = [16, 128], strides = [1, 1]} : vector<128x128xbf16> to vector<16x128xbf16>
    %cst_17 = arith.constant dense<0.000000e+00> : vector<128x128xf32>
    %48 = tpu.matmul %47, %46, %cst_17 {dimension_numbers = #tpu.dot_dimension_numbers<[0], [0], [1], [1], [0, 1, 1, 1], [], []>} : vector<16x128xbf16>, vector<16x128xbf16>, vector<128x128xf32> -> vector<128x128xf32>
    %cst_18 = arith.constant dense<0xFF800000> : vector<128xf32>
    %49 = vector.multi_reduction <maximumf>, %48, %cst_18 [0] : vector<128x128xf32> to vector<128xf32>
    %50 = vector.shape_cast %49 : vector<128xf32> to vector<1x128xf32>
    %51 = arith.addf %45, %50 : vector<1x128xf32>
    %52 = vector.extract_strided_slice %6 {offsets = [112, 0], sizes = [16, 128], strides = [1, 1]} : vector<128x128xbf16> to vector<16x128xbf16>
    %53 = vector.extract_strided_slice %8 {offsets = [112, 0], sizes = [16, 128], strides = [1, 1]} : vector<128x128xbf16> to vector<16x128xbf16>
    %cst_19 = arith.constant dense<0.000000e+00> : vector<128x128xf32>
    %54 = tpu.matmul %53, %52, %cst_19 {dimension_numbers = #tpu.dot_dimension_numbers<[0], [0], [1], [1], [0, 1, 1, 1], [], []>} : vector<16x128xbf16>, vector<16x128xbf16>, vector<128x128xf32> -> vector<128x128xf32>
    %cst_20 = arith.constant dense<0xFF800000> : vector<128xf32>
    %55 = vector.multi_reduction <maximumf>, %54, %cst_20 [0] : vector<128x128xf32> to vector<128xf32>
    %56 = vector.shape_cast %55 : vector<128xf32> to vector<1x128xf32>
    %57 = arith.addf %51, %56 : vector<1x128xf32>
    %cst_21 = arith.constant dense<0.000000e+00> : vector<128xf32>
    %58 = vector.multi_reduction <add>, %1, %cst_21 [1] : vector<128x128xf32> to vector<128xf32>
    %59 = vector.shape_cast %58 : vector<128xf32> to vector<128x1xf32>
    %cst_22 = arith.constant 1.280000e+02 : f32
    %60 = vector.broadcast %cst_22 : f32 to vector<128x1xf32>
    %61 = arith.divf %59, %60 : vector<128x1xf32>
    %c0_23 = arith.constant 0 : index
    %c0_24 = arith.constant 0 : index
    %62 = vector.load %arg3[%c0_23, %c0_24] : memref<128x128xf32, #tpu.memory_space<vmem>>, vector<128x128xf32>
    %cst_25 = arith.constant dense<0.000000e+00> : vector<128x1xf32>
    %63 = tpu.matmul %62, %61, %cst_25 {dimension_numbers = #tpu.dot_dimension_numbers<[1], [0], [0], [1], [0, 0, 1, 1], [], []>} : vector<128x128xf32>, vector<128x1xf32>, vector<128x1xf32> -> vector<128x1xf32>
    %64 = vector.broadcast %63 : vector<128x1xf32> to vector<128x128xf32>
    %65 = vector.broadcast %57 : vector<1x128xf32> to vector<128x128xf32>
    %66 = arith.mulf %64, %65 : vector<128x128xf32>
    %c0_26 = arith.constant 0 : index
    %c0_27 = arith.constant 0 : index
    %67 = vector.load %arg4[%c0_26, %c0_27] : memref<128x1xf32, #tpu.memory_space<vmem>>, vector<128x1xf32>
    %68 = vector.broadcast %67 : vector<128x1xf32> to vector<128x128xf32>
    %69 = arith.addf %66, %68 : vector<128x128xf32>
    %c0_28 = arith.constant 0 : index
    %c0_29 = arith.constant 0 : index
    %c0_30 = arith.constant 0 : index
    %70 = vector.load %arg5[%c0_28, %c0_29, %c0_30] : memref<1x128x128xf32, #tpu.memory_space<vmem>>, vector<1x128x128xf32>
    %71 = vector.shape_cast %70 : vector<1x128x128xf32> to vector<128x128xf32>
    %72 = vector.shape_cast %69 : vector<128x128xf32> to vector<1x128x128xf32>
    tpu.vector_store %arg5[%c0_28, %c0_29, %c0_30], %72 {strides = array<i32>} : memref<1x128x128xf32, #tpu.memory_space<vmem>>, vector<1x128x128xf32>,
    return
  }
  func.func @transform_0(%arg0: i32) -> (i32, i32, i32) {
    %c0_i32 = arith.constant 0 : i32
    %c0_i32_0 = arith.constant 0 : i32
    %c0_i32_1 = arith.constant 0 : i32
    return %arg0, %c0_i32, %c0_i32_0 : i32, i32, i32
  }
  func.func @transform_1(%arg0: i32) -> (i32, i32) {
    %c0_i32 = arith.constant 0 : i32
    %c0_i32_0 = arith.constant 0 : i32
    %c0_i32_1 = arith.constant 0 : i32
    return %c0_i32, %c0_i32_0 : i32, i32
  }
  func.func @transform_2(%arg0: i32) -> (i32, i32) {
    %c0_i32 = arith.constant 0 : i32
    %c0_i32_0 = arith.constant 0 : i32
    %c0_i32_1 = arith.constant 0 : i32
    return %c0_i32, %c0_i32_0 : i32, i32
  }
  func.func @transform_3(%arg0: i32) -> (i32, i32) {
    %c0_i32 = arith.constant 0 : i32
    %c0_i32_0 = arith.constant 0 : i32
    %c0_i32_1 = arith.constant 0 : i32
    return %c0_i32, %c0_i32_0 : i32, i32
  }
  func.func @transform_4(%arg0: i32) -> (i32, i32, i32) {
    %c0_i32 = arith.constant 0 : i32
    %c0_i32_0 = arith.constant 0 : i32
    %c0_i32_1 = arith.constant 0 : i32
    return %arg0, %c0_i32, %c0_i32_0 : i32, i32, i32
  }
}

</mosaic_0001>

<bundles_post_ra>
// kernel: attention_maxpool_pallas.1
= control target key start
LH: loop header
LB: loop body
LE: loop exit
PB: predicated region body
PF: predicated region fallthrough
CT: control target
= control target key end

     0   :  { %9 = vsyncpa [#allocation3], 0  ;;  %s3424_s0 = inlined_call_operand.vmem [shape: f32[2,128,128], index: 0, kind: input, shape index: {}]   ;;  %s3425_s1 = inlined_call_operand.vmem [shape: bf16[256,128], index: 1, kind: input, shape index: {}]   ;;  %s3426_s2 = inlined_call_operand.vmem [shape: f32[128,128], index: 2, kind: input, shape index: {}]   ;;  %s3427_s3 = inlined_call_operand.vmem [shape: f32[128,1], index: 3, kind: input, shape index: {}]   ;;  %s3428_s4 = inlined_call_operand.hbm [shape: f32[2,128,128], index: 4, kind: output, shape index: {}]  }
   0x1   :  { %11 = vsyncpa [#allocation3 + $0x1], 0  ;;  %s2930_s15 = smov 0   ;;  %s2932_s16 = smov 0  }
   0x2   :  { %s2934_s17 = smov 0   ;;  %s2936_s18 = smov 0  }
   0x3 LB: > { %s2951_s19 = sadd.s32 4294967295, %s2899_s18   ;;  %s2309_s20 = sadd.s32 4294967294, %s2899_s18   ;;  %s2899_s18 = sphi %s2936_s18, %s3434_s18   ;;  %s2895_s17 = sphi %s2934_s17, %s3433_s17   ;;  %s2891_s16 = sphi %s2932_s16, %s3432_s16   ;;  %s2887_s15 = sphi %s2930_s15, %s3431_s15  }
   0x4   : > { %s2955_s21 = sadd.s32 1, %s2899_s18   ;;  %s113_s22 = sadd.s32 1, %s2895_s17 }
   0x5   : > { %s110_s23 = ssub.s32 %s2899_s18, %s2955_s21  ;;  %p123_p0 = scmp.ne.s32.totalorder %s2895_s17, %s2891_s16 }
   0x6   : > { %p111_p1 = scmp.eq.s32.totalorder %s110_s23, 0  ;;  %p124_p2 = scmp.eq.s32.totalorder %s2951_s19, 1 }
   0x7   : > { %p129_p3 = scmp.ne.s32.totalorder %s2891_s16, %s2887_s15  ;;  %p130_p4 = scmp.eq.s32.totalorder %s2309_s20, 1 }
   0x8   : > { %s2966_s24 = scalar_select %p111_p1, %s2895_s17, %s113_s22  }
   0x9   : > { %p2968_p5 = por %p124_p2, %p123_p0  ;;  %p2972_p6 = por %p130_p4, %p129_p3 }
   0xa   : > { %p2312_p7 = scmp.ge.s32.totalorder %s2899_s18, 1  ;;  %p165_p8 = scmp.lt.s32.totalorder %s2899_s18, 3 }
   0xc   : > { %p166_p9 = pnand %p2312_p7, %p165_p8 }
   0xd   : > { %p191_p10 = scmp.lt.s32.totalorder (!%p166_p9), %s2951_s19, 1  ;;  %s188_s23 = sand.u32 (!%p166_p9), 1, %s2891_s16  }
   0xe   : > { %169 = sbr.rel (%p166_p9) target bundleno = 926 (0x39e), region = 36  ;;  %s2313_s27 = sshll.u32 (!%p166_p9), %s188_s23, 7 }
   0xf   : > { %s3341_s28 = scalar_lea.vmem (!%p166_p9), [#allocation2], %s2313_s27  ;;  %s3384_s8 = scalar_lea.sflag (!%p166_p9), [#allocation3], %s188_s23 }
  0x10   : > { %s2902_s9 = smov (!%p166_p9), [#allocation2]  }
  0x11   : > { %s2843_s10 = sshll.u32 (!%p166_p9), %s2902_s9, 4  ;;  %s2844_s10 = int_to_ptr.vmem [resolvable:$false] %s2843_s10 }
  0x12   : > { %s2845_s11 = scalar_lea.vmem (!%p166_p9), %s2844_s10, 4096 }
  0x13   : > { %v2823_v0 = vld [vmem:[%s3425_s1] sm:$0xff]   ;;  %s192_s29 = scalar_select %p191_p10, %s2951_s19, 1  ;;  %v2824_v25 = vld [vmem:[%s3425_s1 + $0x8] sm:$0xff]   ;;  %v2825_v26 = vld [vmem:[%s3425_s1 + $0x10] sm:$0xff]   ;;  %vm542_vm0 = vcmask 130048  }
  0x14   : > { %2547 = vmatprep.mubr.bf16.mxu0 %v2823_v0  ;;  %v2826_v27 = vld [vmem:[%s3425_s1 + $0x18] sm:$0xff]   ;;  %v2827_v28 = vld [vmem:[%s3425_s1 + $0x20] sm:$0xff]   ;;  %v2828_v29 = vld [vmem:[%s3425_s1 + $0x28] sm:$0xff]  }
  0x15   : > { %s2401_s30 = sshll.u32 %s192_s29, 7  ;;  %v2829_v30 = vld [vmem:[%s3425_s1 + $0x30] sm:$0xff]   ;;  %v2830_v31 = vld [vmem:[%s3425_s1 + $0x38] sm:$0xff]   ;;  %v2831_v32 = vld [vmem:[%s3425_s1 + $0x40] sm:$0xff]   ;;  %s2402_s29 = sshll.u32 %s2951_s19, 11 }
  0x16   : > { %s2986_s7 = scalar_lea.vmem %s3424_s0, %s2401_s30  ;;  %v2832_v33 = vld [vmem:[%s3425_s1 + $0x48] sm:$0xff]   ;;  %v2833_v34 = vld [vmem:[%s3425_s1 + $0x50] sm:$0xff]   ;;  %v2834_v35 = vld [vmem:[%s3425_s1 + $0x58] sm:$0xff]   ;;  %s2247_s30 = sshll.u32 %s3341_s28, 4  ;;  %s3379_s30 = int_to_ptr.vmem [resolvable:$true] %s2247_s30 }
  0x17   : > { %v211_v1 = vld [vmem:[%s2986_s7 + $0x70] sm:$0xff]  ;;  %v212_v2 = vld [vmem:[%s2986_s7 + $0x78] sm:$0xff]  ;;  %v209_v3 = vld [vmem:[%s2986_s7 + $0x60] sm:$0xff]  ;;  %s2839_s19 = scalar_lea.vmem %s3379_s30, 2048  ;;  %p2846_p0 = scmp.lt.s32.totalorder %s3379_s30, %s2844_s10 }
  0x18   : > { %v220_v4 = vpack.c.bf16 %v212_v2, %v211_v1  ;;  %v210_v5 = vld [vmem:[%s2986_s7 + $0x68] sm:$0xff]  ;;  %1829 = vadd.xlane.f32.xlu1 %v212_v2  ;;  %v207_v7 = vld [vmem:[%s2986_s7 + $0x50] sm:$0xff]  ;;  %v208_v8 = vld [vmem:[%s2986_s7 + $0x58] sm:$0xff]  ;;  %p2840_p11 = scmp.ne.s32.totalorder %s3379_s30, %s2839_s19  ;;  %p2847_p1 = scmp.lt.s32.totalorder %s2845_s11, %s2839_s19 }
  0x19   : > { %v219_v6 = vpack.c.bf16 %v210_v5, %v209_v3  ;;  %v218_v9 = vpack.c.bf16 %v208_v8, %v207_v7  ;;  %v2995_v10 = vld [vmem:[%s2986_s7 + $0x40] sm:$0xff]  ;;  %v2998_v11 = vld [vmem:[%s2986_s7 + $0x48] sm:$0xff]  ;;  %v3003_v13 = vld [vmem:[%s2986_s7 + $0x30] sm:$0xff] }
  0x1a   : > { %2531 = vmatprep.subr.bf16.mxu0 %v220_v4  ;;  %v217_v12 = vpack.c.bf16 %v2998_v11, %v2995_v10  ;;  %v3006_v14 = vld [vmem:[%s2986_s7 + $0x38] sm:$0xff]  ;;  %v3011_v16 = vld [vmem:[%s2986_s7 + $0x20] sm:$0xff]  ;;  %v3014_v17 = vld [vmem:[%s2986_s7 + $0x28] sm:$0xff]  ;;  %p2841_p12 = pnand %p2840_p11, %p2968_p5  ;;  %p2848_p2 = por %p2847_p1, %p2846_p0 }
  0x1b   : > { %2532 = vmatpush3.bf16.msra.mxu0 %v220_v4  ;;  %v216_v15 = vpack.c.bf16 %v3006_v14, %v3003_v13  ;;  %v215_v18 = vpack.c.bf16 %v3014_v17, %v3011_v16  ;;  %v3019_v19 = vld [vmem:[%s2986_s7 + $0x10] sm:$0xff]  ;;  %v3022_v20 = vld [vmem:[%s2986_s7 + $0x18] sm:$0xff]  ;;  %v3027_v22 = vld [vmem:[%s2986_s7] sm:$0xff] }
  0x1c   : > { %2533 = vmatprep.subr.bf16.mxu0 %v219_v6  ;;  %1827 = vadd.xlane.f32.xlu1 %v211_v1  ;;  %v214_v21 = vpack.c.bf16 %v3022_v20, %v3019_v19  ;;  %v3030_v23 = vld [vmem:[%s2986_s7 + $0x8] sm:$0xff]  ;;  %v2835_v36 = vld [vmem:[%s3425_s1 + $0x60] sm:$0xff]   ;;  %v2837_v38 = vld [vmem:[%s3425_s1 + $0x70] sm:$0xff]   ;;  %s3377_s7 = scalar_lea.hbm %s3428_s4, %s2402_s29  ;;  %p2842_p13 = pneg %p2841_p12 }
  0x1d   : > { %v213_v24 = vpack.c.bf16 %v3030_v23, %v3027_v22  ;;  %v2836_v37 = vld [vmem:[%s3425_s1 + $0x68] sm:$0xff]   ;;  %v2838_v39 = vld [vmem:[%s3425_s1 + $0x78] sm:$0xff]  }
  0x1e   : > { %p2849_p3 = pnand %p2848_p2, %p2842_p13 }
  0x1f   : > { %2534 = vmatpush3.bf16.msra.mxu0 %v219_v6 }
  0x20   : > { %2535 = vmatprep.subr.bf16.mxu0 %v218_v9  ;;  %1825 = vadd.xlane.f32.xlu1 %v210_v5 }
  0x23   : > { %2536 = vmatpush3.bf16.msra.mxu0 %v218_v9 }
  0x24   : > { %2537 = vmatprep.subr.bf16.mxu0 %v217_v12  ;;  %1823 = vadd.xlane.f32.xlu1 %v209_v3 }
  0x27   : > { %2538 = vmatpush3.bf16.msra.mxu0 %v217_v12 }
  0x28   : > { %2539 = vmatprep.subr.bf16.mxu0 %v216_v15  ;;  %1821 = vadd.xlane.f32.xlu1 %v208_v8 }
  0x2b   : > { %2540 = vmatpush3.bf16.msra.mxu0 %v216_v15 }
  0x2c   : > { %2541 = vmatprep.subr.bf16.mxu0 %v215_v18  ;;  %1819 = vadd.xlane.f32.xlu1 %v207_v7 }
  0x2f   : > { %2542 = vmatpush3.bf16.msra.mxu0 %v215_v18 }
  0x30   : > { %2543 = vmatprep.subr.bf16.mxu0 %v214_v21 }
  0x33   : > { %2544 = vmatpush3.bf16.msra.mxu0 %v214_v21 }
  0x34   : > { %2545 = vmatprep.subr.bf16.mxu0 %v213_v24 }
  0x37   : > { %2546 = vmatpush3.bf16.msra.mxu0 %v213_v24 }
  0x3a   : > { %2548 = vmatmul.mubr.bf16.vlgmr.msra.gmra.mxu0 %v2824_v25 }
  0x3b   : > { %2551 = vmatprep.mubr.bf16.mxu0 %v2825_v26 }
  0x42   : > { %2552 = vmatmul.mubr.bf16.gmra.mxu0 %v2826_v27 }
  0x43   : > { %2555 = vmatprep.mubr.bf16.mxu0 %v2827_v28 }
  0x4a   : > { %2556 = vmatmul.mubr.bf16.gmra.mxu0 %v2828_v29 }
  0x4b   : > { %2559 = vmatprep.mubr.bf16.mxu0 %v2829_v30 }
  0x52   : > { %2560 = vmatmul.mubr.bf16.gmra.mxu0 %v2830_v31 }
  0x53   : > { %2563 = vmatprep.mubr.bf16.mxu0 %v2831_v32 }
  0x5a   : > { %2564 = vmatmul.mubr.bf16.gmra.mxu0 %v2832_v33 }
  0x5b   : > { %2567 = vmatprep.mubr.bf16.mxu0 %v2833_v34 }
  0x62   : > { %2568 = vmatmul.mubr.bf16.gmra.mxu0 %v2834_v35 }
  0x63   : > { %2571 = vmatprep.mubr.bf16.mxu0 %v2835_v36 }
  0x6a   : > { %2572 = vmatmul.mubr.bf16.gmra.mxu0 %v2836_v37 }
  0x6b   : > { %2575 = vmatprep.mubr.bf16.mxu0 %v2837_v38 }
  0x72   : > { %2576 = vmatmul.mubr.bf16.gmra.mxu0 %v2838_v39 }
  0xfa   : > { %v2549_v40 = vpop.f32.mrf.mxu0 }
  0xfc   : > { %v383_v41 = vpop.f32.mrf.mxu0 }
  0xfe   : > { %v2550_v42 = vpop.f32.mrf.mxu0 }
  0xff   : > { %v511_v46 = vpack.c.bf16 %v2550_v42, %v2549_v40 }
 0x100   : > { %v386_v43 = vpop.f32.mrf.mxu0 }
 0x101   : > { %v510_v44 = vpack.c.bf16 %v386_v43, %v383_v41 }
 0x102   : > { %v2553_v45 = vpop.f32.mrf.mxu0 }
 0x103   : > { %2579 = vmatprep.subr.bf16.mxu1 %v510_v44 }
 0x104   : > { %v399_v47 = vpop.f32.mrf.mxu0  ;;  %2580 = vmatpush3.bf16.msra.mxu1 %v510_v44 }
 0x105   : > { %2597 = vmatprep.subr.bf16.mxu1 %v511_v46 }
 0x106   : > { %v2554_v48 = vpop.f32.mrf.mxu0 }
 0x107   : > { %v513_v49 = vpack.c.bf16 %v2554_v48, %v2553_v45 }
 0x108   : > { %v402_v50 = vpop.f32.mrf.mxu0 }
 0x109   : > { %v3079_v51 = vpack.c.bf16 %v402_v50, %v399_v47  ;;  %2633 = vmatprep.subr.bf16.mxu0 %v513_v49 }
 0x10a   : > { %v2557_v52 = vpop.f32.mrf.mxu0  ;;  %2634 = vmatpush3.bf16.msra.mxu0 %v513_v49 }
 0x10c   : > { %v415_v53 = vpop.f32.mrf.mxu0 }
 0x10e   : > { %v2558_v54 = vpop.f32.mrf.mxu0 }
 0x10f   : > { %v3081_v55 = vpack.c.bf16 %v2558_v54, %v2557_v52 }
 0x110   : > { %v418_v56 = vpop.f32.mrf.mxu0 }
 0x111   : > { %v3083_v57 = vpack.c.bf16 %v418_v56, %v415_v53  ;;  %2669 = vmatprep.subr.bf16.mxu0 %v3081_v55 }
 0x112   : > { %v2561_v58 = vpop.f32.mrf.mxu0 }
 0x114   : > { %v431_v59 = vpop.f32.mrf.mxu0 }
 0x116   : > { %v2562_v60 = vpop.f32.mrf.mxu0 }
 0x117   : > { %v3086_v61 = vpack.c.bf16 %v2562_v60, %v2561_v58 }
 0x118   : > { %v434_v62 = vpop.f32.mrf.mxu0 }
 0x119   : > { %v3088_v63 = vpack.c.bf16 %v434_v62, %v431_v59 }
 0x11a   : > { %v2565_v0 = vpop.f32.mrf.mxu0 }
 0x11c   : > { %v447_v1 = vpop.f32.mrf.mxu0 }
 0x11e   : > { %v2566_v2 = vpop.f32.mrf.mxu0 }
 0x11f   : > { %v519_v25 = vpack.c.bf16 %v2566_v2, %v2565_v0 }
 0x120   : > { %v450_v3 = vpop.f32.mrf.mxu0 }
 0x121   : > { %v518_v4 = vpack.c.bf16 %v450_v3, %v447_v1 }
 0x122   : > { %v3090_v5 = vpop.f32.mrf.mxu0 }
 0x123   : > { %526 = vxpose.xlu0.c.b16.start.end [1/1] (short) %v518_v4, 128 }
 0x124   : > { %v463_v6 = vpop.f32.mrf.mxu0 }
 0x126   : > { %v3092_v7 = vpop.f32.mrf.mxu0 }
 0x127   : > { %v521_v8 = vpack.c.bf16 %v3092_v7, %v3090_v5 }
 0x128   : > { %v466_v9 = vpop.f32.mrf.mxu0 }
 0x129   : > { %v520_v12 = vpack.c.bf16 %v466_v9, %v463_v6 }
 0x12a   : > { %v3096_v15 = vpop.f32.mrf.mxu0 }
 0x12b   : > { %845 = vxpose.xlu1.c.b16.start.end [1/1] (short) %v520_v12, 128 }
 0x12c   : > { %v479_v18 = vpop.f32.mrf.mxu0 }
 0x12e   : > { %v3098_v21 = vpop.f32.mrf.mxu0 }
 0x12f   : > { %v523_v24 = vpack.c.bf16 %v3098_v21, %v3096_v15 }
 0x130   : > { %v482_v26 = vpop.f32.mrf.mxu0 }
 0x131   : > { %v522_v27 = vpack.c.bf16 %v482_v26, %v479_v18 }
 0x140   : > { %686 = vxpose.xlu0.c.b16.start.end [1/1] (short) %v519_v25, 128 }
 0x154   : > { %1815 = vadd.xlane.f32.xlu1 %v2995_v10 }
 0x158   : > { %1813 = vadd.xlane.f32.xlu1 %v3006_v14  ;;  %v3114_v14 = vpop.xlane.xlu1 %1829 }
 0x159   : > { %v1847_v1 = vmul.f32 0.0078125, %v3114_v14 }
 0x15c   : > { %1811 = vadd.xlane.f32.xlu1 %v3003_v13 }
 0x15d   : > { %1163 = vxpose.xlu0.c.b16.start.end [1/1] (short) %v522_v27, 128 }
 0x160   : > { %1809 = vadd.xlane.f32.xlu1 %v3014_v17  ;;  %v2577_v17 = vpop.f32.mrf.mxu0 }
 0x164   : > { %1807 = vadd.xlane.f32.xlu1 %v3011_v16 }
 0x168   : > { %1805 = vadd.xlane.f32.xlu1 %v3022_v20 }
 0x16c   : > { %1803 = vadd.xlane.f32.xlu1 %v3019_v19  ;;  %v3118_v19 = vpop.xlane.xlu1 %1827 }
 0x16d   : > { %v1846_v18 = vmul.f32 0.0078125, %v3118_v19 }
 0x170   : > { %1801 = vadd.xlane.f32.xlu1 %v3030_v23 }
 0x174   : > { %1799 = vadd.xlane.f32.xlu1 %v3027_v22  ;;  %v495_v22 = vpop.f32.mrf.mxu0 }
 0x176   : > { %v2578_v28 = vpop.f32.mrf.mxu0 }
 0x178   : > { %v498_v30 = vpop.f32.mrf.mxu0 }
 0x179   : > { %v524_v33 = vpack.c.bf16 %v498_v30, %v495_v22 }
 0x185   : > { %v534_v10 = vpop.trf.xlu0 }
 0x186   : > { %2581 = vmatprep.mubr.msk.bf16.mxu1 %vm542_vm0, %v534_v10  ;;  %1817 = vadd.xlane.f32.xlu0 %v2998_v11  ;;  %v3122_v11 = vpop.xlane.xlu1 %1825 }
 0x189   : > { %v535_v13 = vpop.trf.xlu0 }
 0x18a   : > { %2582 = vmatmul.mubr.msk.bf16.vlgmr.msra.gmra.mxu1 %vm542_vm0, %v535_v13  ;;  %v3125_v31 = vpop.xlane.xlu1 %1823 }
 0x18b   : > { %2598 = vmatpush3.bf16.msra.mxu1 %v511_v46  ;;  %v1844_v25 = vmul.f32 0.0078125, %v3125_v31 }
 0x18c   : > { %2615 = vmatprep.subr.bf16.mxu1 %v3079_v51 }
 0x18d   : > { %v536_v16 = vpop.trf.xlu0 }
 0x18e   : > { %2585 = vmatprep.mubr.msk.bf16.mxu1 %vm542_vm0, %v536_v16  ;;  %v3129_v35 = vpop.xlane.xlu1 %1821 }
 0x18f   : > { %v1843_v10 = vmul.f32 0.0078125, %v3129_v35 }
 0x191   : > { %v537_v20 = vpop.trf.xlu0 }
 0x192   : > { %2586 = vmatmul.mubr.msk.bf16.gmra.mxu1 %vm542_vm0, %v537_v20  ;;  %v3132_v37 = vpop.xlane.xlu1 %1819 }
 0x193   : > { %v1842_v13 = vmul.f32 0.0078125, %v3132_v37 }
 0x195   : > { %v538_v23 = vpop.trf.xlu0 }
 0x196   : > { %2589 = vmatprep.mubr.msk.bf16.mxu1 %vm542_vm0, %v538_v23  ;;  %v853_v40 = vpop.trf.xlu1 }
 0x199   : > { %v539_v29 = vpop.trf.xlu0 }
 0x19a   : > { %2590 = vmatmul.mubr.msk.bf16.gmra.mxu1 %vm542_vm0, %v539_v29  ;;  %v854_v42 = vpop.trf.xlu1 }
 0x19d   : > { %v540_v32 = vpop.trf.xlu0 }
 0x19e   : > { %2593 = vmatprep.mubr.msk.bf16.mxu1 %vm542_vm0, %v540_v32  ;;  %v855_v45 = vpop.trf.xlu1 }
 0x1a1   : > { %v541_v34 = vpop.trf.xlu0  ;;  %1481 = vxpose.xlu1.c.b16.start.end [1/1] (short) %v524_v33, 128 }
 0x1a2   : > { %2594 = vmatmul.mubr.msk.bf16.gmra.mxu1 %vm542_vm0, %v541_v34  ;;  %v856_v47 = vpop.trf.xlu1  ;;  %v1848_v34 = vld [vmem:[%s3426_s2] sm:$0xff] }
 0x1a5   : > { %v694_v36 = vpop.trf.xlu0 }
 0x1a6   : > { %2599 = vmatprep.mubr.msk.bf16.mxu1 %vm542_vm0, %v694_v36  ;;  %v857_v49 = vpop.trf.xlu1 }
 0x1a9   : > { %v695_v38 = vpop.trf.xlu0 }
 0x1aa   : > { %2600 = vmatmul.mubr.msk.bf16.vlgmr.msra.gmra.mxu1 %vm542_vm0, %v695_v38  ;;  %v858_v50 = vpop.trf.xlu1 }
 0x1ab   : > { %2616 = vmatpush3.bf16.msra.mxu1 %v3079_v51  ;;  %v525_v51 = vpack.c.bf16 %v2578_v28, %v2577_v17 }
 0x1ac   : > { %2651 = vmatprep.subr.bf16.mxu1 %v3083_v57 }
 0x1ad   : > { %v696_v39 = vpop.trf.xlu0 }
 0x1ae   : > { %2603 = vmatprep.mubr.msk.bf16.mxu1 %vm542_vm0, %v696_v39  ;;  %v859_v52 = vpop.trf.xlu1 }
 0x1b1   : > { %v697_v41 = vpop.trf.xlu0 }
 0x1b2   : > { %2604 = vmatmul.mubr.msk.bf16.gmra.mxu1 %vm542_vm0, %v697_v41  ;;  %v860_v54 = vpop.trf.xlu1 }
 0x1b3   : > { %1004 = vxpose.xlu0.c.b16.start.end [1/1] (short) %v521_v8, 128 }
 0x1b5   : > { %v698_v43 = vpop.trf.xlu0 }
 0x1b6   : > { %2607 = vmatprep.mubr.msk.bf16.mxu1 %vm542_vm0, %v698_v43 }
 0x1b9   : > { %v699_v44 = vpop.trf.xlu0 }
 0x1ba   : > { %2608 = vmatmul.mubr.msk.bf16.gmra.mxu1 %vm542_vm0, %v699_v44  ;;  %v1851_v44 = vld [vmem:[%s3426_s2 + $0x18] sm:$0xff] }
 0x1bd   : > { %v700_v46 = vpop.trf.xlu0 }
 0x1be   : > { %2611 = vmatprep.mubr.msk.bf16.mxu1 %vm542_vm0, %v700_v46  ;;  %1322 = vxpose.xlu1.c.b16.start.end [1/1] (short) %v523_v24, 128  ;;  %v1845_v24 = vmul.f32 0.0078125, %v3122_v11  ;;  %v1852_v46 = vld [vmem:[%s3426_s2 + $0x20] sm:$0xff] }
 0x1c1   : > { %v701_v48 = vpop.trf.xlu0 }
 0x1c2   : > { %2612 = vmatmul.mubr.msk.bf16.gmra.mxu1 %vm542_vm0, %v701_v48 }
 0x1c3   : > { %2617 = vmatprep.mubr.msk.bf16.mxu1 %vm542_vm0, %v853_v40  ;;  %v1849_v40 = vld [vmem:[%s3426_s2 + $0x8] sm:$0xff] }
 0x1c5   : > { %v1171_v53 = vpop.trf.xlu0 }
 0x1c9   : > { %v1172_v56 = vpop.trf.xlu0 }
 0x1ca   : > { %2618 = vmatmul.mubr.msk.bf16.vlgmr.msra.gmra.mxu1 %vm542_vm0, %v854_v42  ;;  %v1850_v42 = vld [vmem:[%s3426_s2 + $0x10] sm:$0xff] }
 0x1cb   : > { %2652 = vmatpush3.bf16.msra.mxu1 %v3083_v57  ;;  %2621 = vmatprep.mubr.msk.bf16.mxu1 %vm542_vm0, %v855_v45 }
 0x1cc   : > { %2687 = vmatprep.subr.bf16.mxu1 %v3088_v63 }
 0x1cd   : > { %v1173_v58 = vpop.trf.xlu0 }
 0x1d0   : > { %1640 = vxpose.xlu0.c.b16.start.end [1/1] (short) %v525_v51, 128  ;;  %v1855_v51 = vld [vmem:[%s3426_s2 + $0x38] sm:$0xff] }
 0x1d1   : > { %v1174_v62 = vpop.trf.xlu0 }
 0x1d2   : > { %2622 = vmatmul.mubr.msk.bf16.gmra.mxu1 %vm542_vm0, %v856_v47  ;;  %v1853_v47 = vld [vmem:[%s3426_s2 + $0x28] sm:$0xff] }
 0x1d3   : > { %2625 = vmatprep.mubr.msk.bf16.mxu1 %vm542_vm0, %v857_v49  ;;  %v1854_v49 = vld [vmem:[%s3426_s2 + $0x30] sm:$0xff] }
 0x1d5   : > { %v1175_v2 = vpop.trf.xlu0 }
 0x1d9   : > { %v1176_v5 = vpop.trf.xlu0 }
 0x1da   : > { %2626 = vmatmul.mubr.msk.bf16.gmra.mxu1 %vm542_vm0, %v858_v50 }
 0x1db   : > { %2629 = vmatprep.mubr.msk.bf16.mxu1 %vm542_vm0, %v859_v52  ;;  %v1856_v52 = vld [vmem:[%s3426_s2 + $0x40] sm:$0xff] }
 0x1dd   : > { %v1816_v57 = vpop.xlane.xlu1 %1815  ;;  %v1177_v7 = vpop.trf.xlu0 }
 0x1de   : > { %v1840_v19 = vmul.f32 0.0078125, %v1816_v57  ;;  %v2901_v57 = vmov 0  }
 0x1df   : > { %2822 = vset.pattern.permute.xlu1 %v2901_v57  ;;  %2821 = vset.pattern.permute.xlu0 %v2901_v57 }
 0x1e1   : > { %v1814_v59 = vpop.xlane.xlu1 %1813  ;;  %v1178_v9 = vpop.trf.xlu0 }
 0x1e2   : > { %2630 = vmatmul.mubr.msk.bf16.gmra.mxu1 %vm542_vm0, %v860_v54  ;;  %v1839_v22 = vmul.f32 0.0078125, %v1814_v59  ;;  %v1857_v54 = vld [vmem:[%s3426_s2 + $0x48] sm:$0xff]  ;;  %v1859_v59 = vld [vmem:[%s3426_s2 + $0x58] sm:$0xff] }
 0x1e3   : > { %2653 = vmatprep.mubr.msk.bf16.mxu1 %vm542_vm0, %v1171_v53 }
 0x1e5   : > { %v1812_v60 = vpop.xlane.xlu1 %1811 }
 0x1e6   : > { %v1838_v11 = vmul.f32 0.0078125, %v1812_v60  ;;  %v1860_v60 = vld [vmem:[%s3426_s2 + $0x60] sm:$0xff] }
 0x1e9   : > { %v3160_v0 = vpop.xlane.xlu1 %1809 }
 0x1ea   : > { %2654 = vmatmul.mubr.msk.bf16.vlgmr.msra.gmra.mxu1 %vm542_vm0, %v1172_v56  ;;  %v1837_v29 = vmul.f32 0.0078125, %v3160_v0  ;;  %v1858_v56 = vld [vmem:[%s3426_s2 + $0x50] sm:$0xff]  ;;  %v2108_v0 = vld [vmem:[%s3427_s3 + $0x18] sm:$0xff] }
 0x1eb   : > { %2688 = vmatpush3.bf16.msra.mxu1 %v3088_v63  ;;  %2657 = vmatprep.mubr.msk.bf16.mxu1 %vm542_vm0, %v1173_v58  ;;  %v2106_v58 = vld [vmem:[%s3427_s3 + $0x8] sm:$0xff] }
 0x1ec   : > { %2723 = vmatprep.subr.mxu1 %v1847_v1  ;;  %2128 = vperm.xlu1 %2822, %v2106_v58  }
 0x1ed   : > { %v3166_v3 = vpop.xlane.xlu1 %1807 }
 0x1ee   : > { %v1836_v31 = vmul.f32 0.0078125, %v3166_v3  ;;  %v2110_v3 = vld [vmem:[%s3427_s3 + $0x28] sm:$0xff] }
 0x1f0   : > { %2138 = vperm.xlu1 %2822, %v2108_v0  }
 0x1f1   : > { %v3168_v4 = vpop.xlane.xlu1 %1805 }
 0x1f2   : > { %2658 = vmatmul.mubr.msk.bf16.gmra.mxu1 %vm542_vm0, %v1174_v62  ;;  %v1835_v32 = vmul.f32 0.0078125, %v3168_v4 }
 0x1f3   : > { %2661 = vmatprep.mubr.msk.bf16.mxu1 %vm542_vm0, %v1175_v2  ;;  %v2105_v2 = vld [vmem:[%s3427_s3] sm:$0xff] }
 0x1f4   : > { %2148 = vperm.xlu1 %2822, %v2110_v3  }
 0x1f5   : > { %v3172_v6 = vpop.xlane.xlu1 %1803  ;;  %2123 = vperm.xlu0 %2821, %v2105_v2  }
 0x1f6   : > { %v1834_v35 = vmul.f32 0.0078125, %v3172_v6 }
 0x1f9   : > { %v3174_v8 = vpop.xlane.xlu1 %1801 }
 0x1fa   : > { %2662 = vmatmul.mubr.msk.bf16.gmra.mxu1 %vm542_vm0, %v1176_v5  ;;  %v1833_v36 = vmul.f32 0.0078125, %v3174_v8  ;;  %v1863_v5 = vld [vmem:[%s3426_s2 + $0x78] sm:$0xff] }
 0x1fb   : > { %2665 = vmatprep.mubr.msk.bf16.mxu1 %vm542_vm0, %v1177_v7  ;;  %v2107_v7 = vld [vmem:[%s3427_s3 + $0x10] sm:$0xff]  ;;  %v2112_v8 = vld [vmem:[%s3427_s3 + $0x38] sm:$0xff] }
 0x1fc   : > { %2133 = vperm.xlu0 %2821, %v2107_v7   ;;  %2158 = vperm.xlu1 %2822, %v2112_v8  }
 0x1fd   : > { %v3178_v63 = vpop.xlane.xlu1 %1799 }
 0x1fe   : > { %v1832_v39 = vmul.f32 0.0078125, %v3178_v63 }
 0x202   : > { %2666 = vmatmul.mubr.msk.bf16.gmra.mxu1 %vm542_vm0, %v1178_v9 }
 0x203   : > { %v1489_v12 = vpop.trf.xlu1 }
 0x204   : > { %2689 = vmatprep.mubr.msk.bf16.mxu1 %vm542_vm0, %v1489_v12  ;;  %v2109_v12 = vld [vmem:[%s3427_s3 + $0x20] sm:$0xff] }
 0x205   : > { %2143 = vperm.xlu0 %2821, %v2109_v12  }
 0x207   : > { %v1490_v15 = vpop.trf.xlu1 }
 0x20a   : > { %2690 = vmatmul.mubr.msk.bf16.vlgmr.msra.gmra.mxu1 %vm542_vm0, %v1490_v15  ;;  %v2114_v15 = vld [vmem:[%s3427_s3 + $0x48] sm:$0xff] }
 0x20b   : > { %2724 = vmatpush3.msra.mxu1 %v1847_v1  ;;  %v1491_v21 = vpop.trf.xlu1  ;;  %v1862_v1 = vld [vmem:[%s3426_s2 + $0x70] sm:$0xff]  ;;  %2168 = vperm.xlu1 %2822, %v2114_v15  }
 0x20c   : > { %2725 = vmatprep.subr.mxu1 %v1846_v18  ;;  %2693 = vmatprep.mubr.msk.bf16.mxu1 %vm542_vm0, %v1491_v21 }
 0x20d   : > { %2726 = vmatpush3.msra.mxu1 %v1846_v18 }
 0x20e   : > { %2727 = vmatprep.subr.mxu1 %v1845_v24 }
 0x20f   : > { %2728 = vmatpush3.msra.mxu1 %v1845_v24  ;;  %v1818_v26 = vpop.xlane.xlu0 %1817  ;;  %v1492_v27 = vpop.trf.xlu1 }
 0x210   : > { %2729 = vmatprep.subr.mxu1 %v1844_v25  ;;  %v1841_v14 = vmul.f32 0.0078125, %v1818_v26  ;;  %v2116_v26 = vld [vmem:[%s3427_s3 + $0x58] sm:$0xff] }
 0x211   : > { %2730 = vmatpush3.msra.mxu1 %v1844_v25  ;;  %v2111_v25 = vld [vmem:[%s3427_s3 + $0x30] sm:$0xff]  ;;  %2178 = vperm.xlu1 %2822, %v2116_v26  }
 0x212   : > { %2731 = vmatprep.subr.mxu1 %v1843_v10  ;;  %2694 = vmatmul.mubr.msk.bf16.gmra.mxu1 %vm542_vm0, %v1492_v27 }
 0x213   : > { %2732 = vmatpush3.msra.mxu1 %v1843_v10  ;;  %v1493_v16 = vpop.trf.xlu1  ;;  %2153 = vperm.xlu0 %2821, %v2111_v25  }
 0x214   : > { %2733 = vmatprep.subr.mxu1 %v1842_v13  ;;  %2697 = vmatprep.mubr.msk.bf16.mxu1 %vm542_vm0, %v1493_v16  ;;  %v2113_v16 = vld [vmem:[%s3427_s3 + $0x40] sm:$0xff] }
 0x215   : > { %2734 = vmatpush3.msra.mxu1 %v1842_v13  ;;  %v1012_v17 = vpop.trf.xlu0 }
 0x216   : > { %2735 = vmatprep.subr.mxu1 %v1841_v14  ;;  %2635 = vmatprep.mubr.msk.bf16.mxu0 %vm542_vm0, %v1012_v17  ;;  %v2118_v17 = vld [vmem:[%s3427_s3 + $0x68] sm:$0xff] }
 0x217   : > { %2736 = vmatpush3.msra.mxu1 %v1841_v14  ;;  %v1494_v20 = vpop.trf.xlu1  ;;  %2163 = vperm.xlu0 %2821, %v2113_v16  }
 0x218   : > { %2737 = vmatprep.subr.mxu1 %v1840_v19  ;;  %2188 = vperm.xlu1 %2822, %v2118_v17  }
 0x219   : > { %2738 = vmatpush3.msra.mxu1 %v1840_v19  ;;  %v1013_v23 = vpop.trf.xlu0 }
 0x21a   : > { %2739 = vmatprep.subr.mxu1 %v1839_v22  ;;  %2636 = vmatmul.mubr.msk.bf16.vlgmr.msra.gmra.mxu0 %vm542_vm0, %v1013_v23 }
 0x21b   : > { %2670 = vmatpush3.bf16.msra.mxu0 %v3081_v55  ;;  %2698 = vmatmul.mubr.msk.bf16.gmra.mxu1 %vm542_vm0, %v1494_v20  ;;  %v1495_v28 = vpop.trf.xlu1 }
 0x21c   : > { %2740 = vmatpush3.msra.mxu1 %v1839_v22  ;;  %2705 = vmatprep.subr.bf16.mxu0 %v3086_v61 }
 0x21d   : > { %2741 = vmatprep.subr.mxu1 %v1838_v11  ;;  %v1014_v30 = vpop.trf.xlu0  ;;  %2701 = vmatprep.mubr.msk.bf16.mxu1 %vm542_vm0, %v1495_v28 }
 0x21e   : > { %2742 = vmatpush3.msra.mxu1 %v1838_v11  ;;  %2639 = vmatprep.mubr.msk.bf16.mxu0 %vm542_vm0, %v1014_v30  ;;  %v2115_v11 = vld [vmem:[%s3427_s3 + $0x50] sm:$0xff] }
 0x21f   : > { %2743 = vmatprep.subr.mxu1 %v1837_v29  ;;  %v1496_v55 = vpop.trf.xlu1  ;;  %2173 = vperm.xlu0 %2821, %v2115_v11  }
 0x220   : > { %2744 = vmatpush3.msra.mxu1 %v1837_v29 }
 0x221   : > { %2745 = vmatprep.subr.mxu1 %v1836_v31  ;;  %v1015_v33 = vpop.trf.xlu0 }
 0x222   : > { %2746 = vmatpush3.msra.mxu1 %v1836_v31  ;;  %2640 = vmatmul.mubr.msk.bf16.gmra.mxu0 %vm542_vm0, %v1015_v33 }
 0x223   : > { %2747 = vmatprep.subr.mxu1 %v1835_v32  ;;  %2702 = vmatmul.mubr.msk.bf16.gmra.mxu1 %vm542_vm0, %v1496_v55  ;;  %v1330_v38 = vpop.trf.xlu1  ;;  %v2117_v55 = vld [vmem:[%s3427_s3 + $0x60] sm:$0xff] }
 0x224   : > { %2748 = vmatpush3.msra.mxu1 %v1835_v32  ;;  %2755 = vmatprep.mubr.f32.mxu1 %v1848_v34 }
 0x225   : > { %2749 = vmatprep.subr.mxu1 %v1834_v35  ;;  %v1016_v37 = vpop.trf.xlu0  ;;  %2183 = vperm.xlu0 %2821, %v2117_v55  }
 0x226   : > { %2750 = vmatpush3.msra.mxu1 %v1834_v35  ;;  %2643 = vmatprep.mubr.msk.bf16.mxu0 %vm542_vm0, %v1016_v37 }
 0x227   : > { %2751 = vmatprep.subr.mxu1 %v1833_v36  ;;  %v1331_v43 = vpop.trf.xlu1 }
 0x228   : > { %2752 = vmatpush3.msra.mxu1 %v1833_v36 }
 0x229   : > { %2753 = vmatprep.subr.mxu1 %v1832_v39  ;;  %v1017_v41 = vpop.trf.xlu0 }
 0x22a   : > { %2754 = vmatpush3.msra.mxu1 %v1832_v39  ;;  %2644 = vmatmul.mubr.msk.bf16.gmra.mxu0 %vm542_vm0, %v1017_v41 }
 0x22b   : > { %2756 = vmatmul.mubr.f32.vlgmr.msra.gmra.mxu1 %v1849_v40  ;;  %v1332_v50 = vpop.trf.xlu1 }
 0x22c   : > { %2758 = vmatprep.mubr.f32.mxu1 %v1850_v42 }
 0x22d   : > { %v1018_v45 = vpop.trf.xlu0 }
 0x22e   : > { %2647 = vmatprep.mubr.msk.bf16.mxu0 %vm542_vm0, %v1018_v45 }
 0x22f   : > { %2759 = vmatmul.mubr.f32.gmra.mxu1 %v1851_v44  ;;  %v1333_v53 = vpop.trf.xlu1 }
 0x230   : > { %2761 = vmatprep.mubr.f32.mxu1 %v1852_v46 }
 0x231   : > { %v1019_v48 = vpop.trf.xlu0 }
 0x232   : > { %2648 = vmatmul.mubr.msk.bf16.gmra.mxu0 %vm542_vm0, %v1019_v48 }
 0x233   : > { %2762 = vmatmul.mubr.f32.gmra.mxu1 %v1853_v47  ;;  %2671 = vmatprep.mubr.msk.bf16.mxu0 %vm542_vm0, %v1330_v38  ;;  %v1334_v62 = vpop.trf.xlu1 }
 0x234   : > { %2764 = vmatprep.mubr.f32.mxu1 %v1854_v49 }
 0x235   : > { %v1648_v6 = vpop.trf.xlu0 }
 0x237   : > { %2765 = vmatmul.mubr.f32.gmra.mxu1 %v1855_v51  ;;  %v1335_v4 = vpop.trf.xlu1 }
 0x238   : > { %2767 = vmatprep.mubr.f32.mxu1 %v1856_v52 }
 0x239   : > { %v1649_v18 = vpop.trf.xlu0 }
 0x23a   : > { %2672 = vmatmul.mubr.msk.bf16.vlgmr.msra.gmra.mxu0 %vm542_vm0, %v1331_v43 }
 0x23b   : > { %2706 = vmatpush3.bf16.msra.mxu0 %v3086_v61  ;;  %2768 = vmatmul.mubr.f32.gmra.mxu1 %v1857_v54  ;;  %v1861_v61 = vld [vmem:[%s3426_s2 + $0x68] sm:$0xff]  ;;  %v1336_v63 = vpop.trf.xlu1 }
 0x23c   : > { %2770 = vmatprep.mubr.f32.mxu1 %v1858_v56  ;;  %2675 = vmatprep.mubr.msk.bf16.mxu0 %vm542_vm0, %v1332_v50 }
 0x23d   : > { %v1650_v13 = vpop.trf.xlu0 }
 0x23f   : > { %2771 = vmatmul.mubr.f32.gmra.mxu1 %v1859_v59  ;;  %v1337_v27 = vpop.trf.xlu1 }
 0x240   : > { %2773 = vmatprep.mubr.f32.mxu1 %v1860_v60 }
 0x241   : > { %v1651_v29 = vpop.trf.xlu0 }
 0x242   : > { %2676 = vmatmul.mubr.msk.bf16.gmra.mxu0 %vm542_vm0, %v1333_v53 }
 0x243   : > { %2774 = vmatmul.mubr.f32.gmra.mxu1 %v1861_v61  ;;  %2679 = vmatprep.mubr.msk.bf16.mxu0 %vm542_vm0, %v1334_v62 }
 0x244   : > { %2776 = vmatprep.mubr.f32.mxu1 %v1862_v1 }
 0x245   : > { %v1652_v36 = vpop.trf.xlu0 }
 0x247   : > { %2777 = vmatmul.mubr.f32.gmra.mxu1 %v1863_v5 }
 0x249   : > { %v1653_v43 = vpop.trf.xlu0 }
 0x24a   : > { %v2583_v9 = vpop.f32.mrf.mxu1  ;;  %2680 = vmatmul.mubr.msk.bf16.gmra.mxu0 %vm542_vm0, %v1335_v4 }
 0x24b   : > { %2683 = vmatprep.mubr.msk.bf16.mxu0 %vm542_vm0, %v1336_v63 }
 0x24c   : > { %v601_v21 = vpop.f32.mrf.mxu1 }
 0x24d   : > { %v1654_v51 = vpop.trf.xlu0 }
 0x24e   : > { %v2584_v24 = vpop.f32.mrf.mxu1 }
 0x250   : > { %v604_v10 = vpop.f32.mrf.mxu1 }
 0x251   : > { %v1655_v58 = vpop.trf.xlu0 }
 0x252   : > { %v2587_v14 = vpop.f32.mrf.mxu1  ;;  %2684 = vmatmul.mubr.msk.bf16.gmra.mxu0 %vm542_vm0, %v1337_v27 }
 0x253   : > { %v666_v19 = vmax.f32 %v2583_v9, %v2587_v14  ;;  %2707 = vmatprep.mubr.msk.bf16.mxu0 %vm542_vm0, %v1648_v6 }
 0x254   : > { %v617_v20 = vpop.f32.mrf.mxu1 }
 0x255   : > { %v664_v22 = vmax.f32 %v601_v21, %v617_v20 }
 0x256   : > { %v2588_v23 = vpop.f32.mrf.mxu1 }
 0x257   : > { %v667_v28 = vmax.f32 %v2584_v24, %v2588_v23 }
 0x258   : > { %v620_v30 = vpop.f32.mrf.mxu1 }
 0x259   : > { %v665_v31 = vmax.f32 %v604_v10, %v620_v30 }
 0x25a   : > { %v2591_v32 = vpop.f32.mrf.mxu1  ;;  %2708 = vmatmul.mubr.msk.bf16.vlgmr.msra.gmra.mxu0 %vm542_vm0, %v1649_v18 }
 0x25b   : > { %v670_v33 = vmax.f32 %v666_v19, %v2591_v32  ;;  %2711 = vmatprep.mubr.msk.bf16.mxu0 %vm542_vm0, %v1650_v13 }
 0x25c   : > { %v633_v34 = vpop.f32.mrf.mxu1 }
 0x25d   : > { %v668_v35 = vmax.f32 %v664_v22, %v633_v34 }
 0x25e   : > { %v2592_v37 = vpop.f32.mrf.mxu1 }
 0x25f   : > { %v671_v38 = vmax.f32 %v667_v28, %v2592_v37 }
 0x260   : > { %v636_v39 = vpop.f32.mrf.mxu1 }
 0x261   : > { %v669_v40 = vmax.f32 %v665_v31, %v636_v39 }
 0x262   : > { %v2595_v41 = vpop.f32.mrf.mxu1  ;;  %2712 = vmatmul.mubr.msk.bf16.gmra.mxu0 %vm542_vm0, %v1651_v29 }
 0x263   : > { %v674_v42 = vmax.f32 %v670_v33, %v2595_v41  ;;  %2715 = vmatprep.mubr.msk.bf16.mxu0 %vm542_vm0, %v1652_v36 }
 0x264   : > { %v649_v44 = vpop.f32.mrf.mxu1 }
 0x265   : > { %v672_v45 = vmax.f32 %v668_v35, %v649_v44 }
 0x266   : > { %v2596_v46 = vpop.f32.mrf.mxu1 }
 0x267   : > { %v675_v47 = vmax.f32 %v671_v38, %v2596_v46 }
 0x268   : > { %v652_v48 = vpop.f32.mrf.mxu1 }
 0x269   : > { %v677_v49 = vmax.f32 %v674_v42, %v675_v47  ;;  %v673_v50 = vmax.f32 %v669_v40, %v652_v48 }
 0x26a   : > { %v2601_v52 = vpop.f32.mrf.mxu1  ;;  %2716 = vmatmul.mubr.msk.bf16.gmra.mxu0 %vm542_vm0, %v1653_v43 }
 0x26b   : > { %v676_v53 = vmax.f32 %v672_v45, %v673_v50  ;;  %2719 = vmatprep.mubr.msk.bf16.mxu0 %vm542_vm0, %v1654_v51 }
 0x26c   : > { %v760_v54 = vpop.f32.mrf.mxu1 }
 0x26d   : > { %v678_v56 = vmax.f32 %v676_v53, %v677_v49 }
 0x26e   : > { %v2602_v57 = vpop.f32.mrf.mxu1 }
 0x26f   : > { %v679_v25 = vrot.slane %v678_v56, 4 }
 0x270   : > { %v763_v59 = vpop.f32.mrf.mxu1 }
 0x271   : > { %v680_v14 = vmax.f32 %v678_v56, %v679_v25 }
 0x272   : > { %v2605_v60 = vpop.f32.mrf.mxu1  ;;  %2720 = vmatmul.mubr.msk.bf16.gmra.mxu0 %vm542_vm0, %v1655_v58 }
 0x273   : > { %v825_v62 = vmax.f32 %v2601_v52, %v2605_v60  ;;  %v681_v23 = vrot.slane %v680_v14, 2 }
 0x274   : > { %v776_v0 = vpop.f32.mrf.mxu1 }
 0x275   : > { %v823_v61 = vmax.f32 %v760_v54, %v776_v0  ;;  %v682_v31 = vmax.f32 %v680_v14, %v681_v23 }
 0x276   : > { %v2606_v1 = vpop.f32.mrf.mxu1 }
 0x277   : > { %v826_v2 = vmax.f32 %v2602_v57, %v2606_v1  ;;  %v683_v36 = vrot.slane %v682_v31, 1 }
 0x278   : > { %v779_v3 = vpop.f32.mrf.mxu1 }
 0x279   : > { %v824_v4 = vmax.f32 %v763_v59, %v779_v3  ;;  %v684_v43 = vmax.f32 %v682_v31, %v683_v36 }
 0x27a   : > { %v2609_v5 = vpop.f32.mrf.mxu1 }
 0x27b   : > { %v829_v6 = vmax.f32 %v825_v62, %v2609_v5 }
 0x27c   : > { %v792_v7 = vpop.f32.mrf.mxu1 }
 0x27d   : > { %v827_v8 = vmax.f32 %v823_v61, %v792_v7 }
 0x27e   : > { %v2610_v63 = vpop.f32.mrf.mxu1 }
 0x27f   : > { %v830_v9 = vmax.f32 %v826_v2, %v2610_v63 }
 0x280   : > { %v795_v12 = vpop.f32.mrf.mxu1 }
 0x281   : > { %v828_v15 = vmax.f32 %v824_v4, %v795_v12 }
 0x282   : > { %v2613_v18 = vpop.f32.mrf.mxu1 }
 0x283   : > { %v833_v21 = vmax.f32 %v829_v6, %v2613_v18 }
 0x284   : > { %v808_v24 = vpop.f32.mrf.mxu1 }
 0x285   : > { %v831_v26 = vmax.f32 %v827_v8, %v808_v24 }
 0x286   : > { %v2614_v27 = vpop.f32.mrf.mxu1 }
 0x287   : > { %v834_v10 = vmax.f32 %v830_v9, %v2614_v27 }
 0x288   : > { %v811_v13 = vpop.f32.mrf.mxu1 }
 0x289   : > { %v836_v16 = vmax.f32 %v833_v21, %v834_v10  ;;  %v832_v17 = vmax.f32 %v828_v15, %v811_v13 }
 0x28a   : > { %v2619_v19 = vpop.f32.mrf.mxu1 }
 0x28b   : > { %v835_v20 = vmax.f32 %v831_v26, %v832_v17 }
 0x28c   : > { %v919_v22 = vpop.f32.mrf.mxu1 }
 0x28d   : > { %v837_v11 = vmax.f32 %v835_v20, %v836_v16 }
 0x28e   : > { %v2620_v28 = vpop.f32.mrf.mxu1 }
 0x28f   : > { %v838_v29 = vrot.slane %v837_v11, 4 }
 0x290   : > { %v922_v30 = vpop.f32.mrf.mxu1 }
 0x291   : > { %v839_v55 = vmax.f32 %v837_v11, %v838_v29 }
 0x292   : > { %v2623_v32 = vpop.f32.mrf.mxu1 }
 0x293   : > { %v840_v33 = vrot.slane %v839_v55, 2  ;;  %v984_v34 = vmax.f32 %v2619_v19, %v2623_v32 }
 0x294   : > { %v935_v35 = vpop.f32.mrf.mxu1 }
 0x295   : > { %v841_v37 = vmax.f32 %v839_v55, %v840_v33  ;;  %v982_v38 = vmax.f32 %v919_v22, %v935_v35 }
 0x296   : > { %v2624_v39 = vpop.f32.mrf.mxu1 }
 0x297   : > { %v842_v40 = vrot.slane %v841_v37, 1  ;;  %v985_v41 = vmax.f32 %v2620_v28, %v2624_v39 }
 0x298   : > { %v938_v42 = vpop.f32.mrf.mxu1 }
 0x299   : > { %v843_v44 = vmax.f32 %v841_v37, %v842_v40  ;;  %v983_v45 = vmax.f32 %v922_v30, %v938_v42 }
 0x29a   : > { %v2627_v46 = vpop.f32.mrf.mxu1 }
 0x29b   : > { %v844_v47 = vadd.f32 %v843_v44, %v684_v43  ;;  %v988_v48 = vmax.f32 %v984_v34, %v2627_v46 }
 0x29c   : > { %v951_v49 = vpop.f32.mrf.mxu1 }
 0x29d   : > { %v986_v50 = vmax.f32 %v982_v38, %v951_v49 }
 0x29e   : > { %v2628_v51 = vpop.f32.mrf.mxu1 }
 0x29f   : > { %v989_v52 = vmax.f32 %v985_v41, %v2628_v51 }
 0x2a0   : > { %v954_v53 = vpop.f32.mrf.mxu1 }
 0x2a1   : > { %v987_v54 = vmax.f32 %v983_v45, %v954_v53 }
 0x2a2   : > { %v2631_v56 = vpop.f32.mrf.mxu1 }
 0x2a3   : > { %v992_v57 = vmax.f32 %v988_v48, %v2631_v56 }
 0x2a4   : > { %v967_v58 = vpop.f32.mrf.mxu1 }
 0x2a5   : > { %v990_v59 = vmax.f32 %v986_v50, %v967_v58 }
 0x2a6   : > { %v2632_v60 = vpop.f32.mrf.mxu1 }
 0x2a7   : > { %v993_v62 = vmax.f32 %v989_v52, %v2632_v60 }
 0x2a8   : > { %v970_v0 = vpop.f32.mrf.mxu1 }
 0x2a9   : > { %v995_v61 = vmax.f32 %v992_v57, %v993_v62  ;;  %v991_v1 = vmax.f32 %v987_v54, %v970_v0 }
 0x2aa   : > { %v2655_v2 = vpop.f32.mrf.mxu1 }
 0x2ab   : > { %v994_v3 = vmax.f32 %v990_v59, %v991_v1 }
 0x2ac   : > { %v1237_v4 = vpop.f32.mrf.mxu1 }
 0x2ad   : > { %v996_v5 = vmax.f32 %v994_v3, %v995_v61 }
 0x2ae   : > { %v2656_v6 = vpop.f32.mrf.mxu1 }
 0x2af   : > { %v997_v7 = vrot.slane %v996_v5, 4 }
 0x2b0   : > { %v1240_v8 = vpop.f32.mrf.mxu1 }
 0x2b1   : > { %v998_v63 = vmax.f32 %v996_v5, %v997_v7 }
 0x2b2   : > { %v2659_v9 = vpop.f32.mrf.mxu1 }
 0x2b3   : > { %v999_v12 = vrot.slane %v998_v63, 2  ;;  %v1302_v15 = vmax.f32 %v2655_v2, %v2659_v9 }
 0x2b4   : > { %v1253_v18 = vpop.f32.mrf.mxu1 }
 0x2b5   : > { %v1000_v21 = vmax.f32 %v998_v63, %v999_v12  ;;  %v1300_v24 = vmax.f32 %v1237_v4, %v1253_v18 }
 0x2b6   : > { %v2660_v25 = vpop.f32.mrf.mxu1 }
 0x2b7   : > { %v1001_v26 = vrot.slane %v1000_v21, 1  ;;  %v1303_v27 = vmax.f32 %v2656_v6, %v2660_v25 }
 0x2b8   : > { %v1256_v10 = vpop.f32.mrf.mxu1 }
 0x2b9   : > { %v1002_v13 = vmax.f32 %v1000_v21, %v1001_v26  ;;  %v1301_v14 = vmax.f32 %v1240_v8, %v1256_v10 }
 0x2ba   : > { %v2663_v16 = vpop.f32.mrf.mxu1 }
 0x2bb   : > { %v3317_v17 = vadd.f32 %v1002_v13, %v844_v47  ;;  %v1306_v19 = vmax.f32 %v1302_v15, %v2663_v16 }
 0x2bc   : > { %v1269_v20 = vpop.f32.mrf.mxu1 }
 0x2bd   : > { %v1304_v22 = vmax.f32 %v1300_v24, %v1269_v20 }
 0x2be   : > { %v2664_v23 = vpop.f32.mrf.mxu1 }
 0x2bf   : > { %v1307_v11 = vmax.f32 %v1303_v27, %v2664_v23 }
 0x2c0   : > { %v1272_v28 = vpop.f32.mrf.mxu1 }
 0x2c1   : > { %v1305_v29 = vmax.f32 %v1301_v14, %v1272_v28 }
 0x2c2   : > { %v2667_v30 = vpop.f32.mrf.mxu1 }
 0x2c3   : > { %v1310_v31 = vmax.f32 %v1306_v19, %v2667_v30 }
 0x2c4   : > { %v1285_v55 = vpop.f32.mrf.mxu1 }
 0x2c5   : > { %v1308_v32 = vmax.f32 %v1304_v22, %v1285_v55 }
 0x2c6   : > { %v2668_v33 = vpop.f32.mrf.mxu1 }
 0x2c7   : > { %v1311_v34 = vmax.f32 %v1307_v11, %v2668_v33 }
 0x2c8   : > { %v1288_v35 = vpop.f32.mrf.mxu1 }
 0x2c9   : > { %v1313_v36 = vmax.f32 %v1310_v31, %v1311_v34  ;;  %v1309_v37 = vmax.f32 %v1305_v29, %v1288_v35 }
 0x2ca   : > { %v2691_v38 = vpop.f32.mrf.mxu1 }
 0x2cb   : > { %v1312_v39 = vmax.f32 %v1308_v32, %v1309_v37 }
 0x2cc   : > { %v1555_v40 = vpop.f32.mrf.mxu1 }
 0x2cd   : > { %v3319_v41 = vmax.f32 %v1312_v39, %v1313_v36 }
 0x2ce   : > { %v2692_v42 = vpop.f32.mrf.mxu1 }
 0x2d0   : > { %v1558_v43 = vpop.f32.mrf.mxu1 }
 0x2d2   : > { %v2695_v44 = vpop.f32.mrf.mxu1 }
 0x2d3   : > { %v1620_v45 = vmax.f32 %v2691_v38, %v2695_v44  ;;  %v1315_v38 = vrot.slane %v3319_v41, 4 }
 0x2d4   : > { %v1571_v46 = vpop.f32.mrf.mxu1 }
 0x2d5   : > { %v1618_v47 = vmax.f32 %v1555_v40, %v1571_v46 }
 0x2d6   : > { %v2696_v48 = vpop.f32.mrf.mxu1 }
 0x2d7   : > { %v1621_v49 = vmax.f32 %v2692_v42, %v2696_v48  ;;  %v1316_v48 = vmax.f32 %v3319_v41, %v1315_v38 }
 0x2d8   : > { %v1574_v50 = vpop.f32.mrf.mxu1 }
 0x2d9   : > { %v1619_v51 = vmax.f32 %v1558_v43, %v1574_v50 }
 0x2da   : > { %v2637_v52 = vpop.f32.mrf.mxu0 }
 0x2db   : > { %v2699_v53 = vpop.f32.mrf.mxu1 }
 0x2dc   : > { %v1624_v54 = vmax.f32 %v1620_v45, %v2699_v53  ;;  %v1078_v56 = vpop.f32.mrf.mxu0 }
 0x2dd   : > { %v1587_v57 = vpop.f32.mrf.mxu1 }
 0x2de   : > { %v1622_v58 = vmax.f32 %v1618_v47, %v1587_v57  ;;  %v2638_v59 = vpop.f32.mrf.mxu0 }
 0x2df   : > { %v2700_v60 = vpop.f32.mrf.mxu1 }
 0x2e0   : > { %v1625_v62 = vmax.f32 %v1621_v49, %v2700_v60  ;;  %v1081_v0 = vpop.f32.mrf.mxu0 }
 0x2e1   : > { %v1590_v61 = vpop.f32.mrf.mxu1 }
 0x2e2   : > { %v1623_v1 = vmax.f32 %v1619_v51, %v1590_v61  ;;  %v2641_v2 = vpop.f32.mrf.mxu0 }
 0x2e3   : > { %v1143_v3 = vmax.f32 %v2637_v52, %v2641_v2  ;;  %v2703_v4 = vpop.f32.mrf.mxu1 }
 0x2e4   : > { %v1628_v5 = vmax.f32 %v1624_v54, %v2703_v4  ;;  %v1094_v6 = vpop.f32.mrf.mxu0 }
 0x2e5   : > { %v1141_v7 = vmax.f32 %v1078_v56, %v1094_v6  ;;  %v1603_v8 = vpop.f32.mrf.mxu1  ;;  %v1317_v56 = vrot.slane %v1316_v48, 2 }
 0x2e6   : > { %v1626_v63 = vmax.f32 %v1622_v58, %v1603_v8  ;;  %v2642_v9 = vpop.f32.mrf.mxu0 }
 0x2e7   : > { %v1144_v12 = vmax.f32 %v2638_v59, %v2642_v9  ;;  %v2704_v15 = vpop.f32.mrf.mxu1  ;;  %v1318_v61 = vmax.f32 %v1316_v48, %v1317_v56 }
 0x2e8   : > { %v1629_v18 = vmax.f32 %v1625_v62, %v2704_v15  ;;  %v1097_v21 = vpop.f32.mrf.mxu0 }
 0x2e9   : > { %v1142_v24 = vmax.f32 %v1081_v0, %v1097_v21  ;;  %v1606_v25 = vpop.f32.mrf.mxu1  ;;  %v1319_v6 = vrot.slane %v1318_v61, 1 }
 0x2ea   : > { %v1631_v26 = vmax.f32 %v1628_v5, %v1629_v18  ;;  %v1627_v27 = vmax.f32 %v1623_v1, %v1606_v25  ;;  %v2645_v10 = vpop.f32.mrf.mxu0 }
 0x2eb   : > { %v1147_v13 = vmax.f32 %v1143_v3, %v2645_v10  ;;  %v2757_v14 = vpop.f32.mrf.mxu1  ;;  %v1320_v18 = vmax.f32 %v1318_v61, %v1319_v6 }
 0x2ec   : > { %v1630_v16 = vmax.f32 %v1626_v63, %v1627_v27  ;;  %2016 = vperm.xlu0 %2821, %v2757_v14   ;;  %v1110_v19 = vpop.f32.mrf.mxu0 }
 0x2ed   : > { %v1145_v20 = vmax.f32 %v1141_v7, %v1110_v19  ;;  %v1930_v22 = vpop.f32.mrf.mxu1 }
 0x2ee   : > { %v3321_v23 = vmax.f32 %v1630_v16, %v1631_v26  ;;  %2011 = vperm.xlu1 %2822, %v1930_v22   ;;  %v2646_v11 = vpop.f32.mrf.mxu0  ;;  %v2120_v16 = vld [vmem:[%s3427_s3 + $0x78] sm:$0xff] }
 0x2ef   : > { %v1148_v28 = vmax.f32 %v1144_v12, %v2646_v11  ;;  %v2760_v29 = vpop.f32.mrf.mxu1 }
 0x2f0   : > { %v1113_v30 = vpop.f32.mrf.mxu0 }
 0x2f1   : > { %v1940_v31 = vpop.f32.mrf.mxu1  ;;  %v1146_v34 = vmax.f32 %v1142_v24, %v1113_v30  ;;  %v2119_v24 = vld [vmem:[%s3427_s3 + $0x70] sm:$0xff] }
 0x2f2   : > { %2026 = vperm.xlu1 %2822, %v2760_v29   ;;  %v2649_v55 = vpop.f32.mrf.mxu0 }
 0x2f3   : > { %v2763_v32 = vpop.f32.mrf.mxu1  ;;  %v1151_v35 = vmax.f32 %v1147_v13, %v2649_v55 }
 0x2f4   : > { %v1126_v33 = vpop.f32.mrf.mxu0 }
 0x2f5   : > { %v1950_v36 = vpop.f32.mrf.mxu1  ;;  %v1149_v39 = vmax.f32 %v1145_v20, %v1126_v33 }
 0x2f6   : > { %2021 = vperm.xlu1 %2822, %v1940_v31   ;;  %2031 = vperm.xlu0 %2821, %v1950_v36   ;;  %v2650_v37 = vpop.f32.mrf.mxu0 }
 0x2f7   : > { %v1152_v40 = vmax.f32 %v1148_v28, %v2650_v37  ;;  %v2766_v42 = vpop.f32.mrf.mxu1 }
 0x2f8   : > { %v1129_v43 = vpop.f32.mrf.mxu0 }
 0x2f9   : > { %v1154_v44 = vmax.f32 %v1151_v35, %v1152_v40  ;;  %v1150_v45 = vmax.f32 %v1146_v34, %v1129_v43  ;;  %v1960_v46 = vpop.f32.mrf.mxu1 }
 0x2fa   : > { %2036 = vperm.xlu1 %2822, %v2763_v32   ;;  %2041 = vperm.xlu0 %2821, %v1960_v46   ;;  %v2673_v47 = vpop.f32.mrf.mxu0  ;;  %v1633_v32 = vrot.slane %v3321_v23, 4 }
 0x2fb   : > { %v1153_v49 = vmax.f32 %v1149_v39, %v1150_v45  ;;  %v2769_v50 = vpop.f32.mrf.mxu1 }
 0x2fc   : > { %v1396_v51 = vpop.f32.mrf.mxu0  ;;  %v1634_v39 = vmax.f32 %v3321_v23, %v1633_v32 }
 0x2fd   : > { %v1155_v52 = vmax.f32 %v1153_v49, %v1154_v44  ;;  %v1970_v53 = vpop.f32.mrf.mxu1 }
 0x2fe   : > { %2046 = vperm.xlu1 %2822, %v2766_v42   ;;  %2051 = vperm.xlu0 %2821, %v1970_v53   ;;  %v2674_v54 = vpop.f32.mrf.mxu0  ;;  %v1635_v45 = vrot.slane %v1634_v39, 2 }
 0x2ff   : > { %v1156_v57 = vrot.slane %v1155_v52, 4  ;;  %v2772_v58 = vpop.f32.mrf.mxu1 }
 0x300   : > { %v1399_v59 = vpop.f32.mrf.mxu0 }
 0x301   : > { %v1157_v60 = vmax.f32 %v1155_v52, %v1156_v57  ;;  %v1980_v62 = vpop.f32.mrf.mxu1 }
 0x302   : > { %2056 = vperm.xlu1 %2822, %v2769_v50   ;;  %2061 = vperm.xlu0 %2821, %v1980_v62   ;;  %v2677_v0 = vpop.f32.mrf.mxu0  ;;  %v1636_v50 = vmax.f32 %v1634_v39, %v1635_v45 }
 0x303   : > { %v1158_v1 = vrot.slane %v1157_v60, 2  ;;  %v2775_v41 = vpop.f32.mrf.mxu1  ;;  %v1461_v26 = vmax.f32 %v2673_v47, %v2677_v0 }
 0x304   : > { %v1412_v2 = vpop.f32.mrf.mxu0  ;;  %v1637_v56 = vrot.slane %v1636_v50, 1 }
 0x305   : > { %v1159_v3 = vmax.f32 %v1157_v60, %v1158_v1  ;;  %v1990_v4 = vpop.f32.mrf.mxu1  ;;  %v1459_v13 = vmax.f32 %v1396_v51, %v1412_v2 }
 0x306   : > { %2066 = vperm.xlu1 %2822, %v2772_v58   ;;  %2071 = vperm.xlu0 %2821, %v1990_v4   ;;  %v2678_v5 = vpop.f32.mrf.mxu0  ;;  %v1638_v23 = vmax.f32 %v1636_v50, %v1637_v56 }
 0x307   : > { %v1160_v7 = vrot.slane %v1159_v3, 1  ;;  %v2778_v8 = vpop.f32.mrf.mxu1  ;;  %v1462_v14 = vmax.f32 %v2674_v54, %v2678_v5 }
 0x308   : > { %v1415_v63 = vpop.f32.mrf.mxu0 }
 0x309   : > { %v1161_v9 = vmax.f32 %v1159_v3, %v1160_v7  ;;  %v2000_v12 = vpop.f32.mrf.mxu1  ;;  %v1460_v20 = vmax.f32 %v1399_v59, %v1415_v63 }
 0x30a   : > { %2076 = vperm.xlu1 %2822, %v2775_v41   ;;  %2081 = vperm.xlu0 %2821, %v2000_v12   ;;  %v2681_v15 = vpop.f32.mrf.mxu0 }
 0x30b   : > { %v1162_v21 = vadd.f32 %v1161_v9, %v3317_v17  ;;  %v1465_v22 = vmax.f32 %v1461_v26, %v2681_v15 }
 0x30c   : > { %v1428_v25 = vpop.f32.mrf.mxu0 }
 0x30d   : > { %v1321_v27 = vadd.f32 %v1320_v18, %v1162_v21  ;;  %v1463_v11 = vmax.f32 %v1459_v13, %v1428_v25  ;;  %v2124_v21 = vpop.permute.xlu0 %2123 }
 0x30e   : > { %2086 = vperm.xlu1 %2822, %v2778_v8   ;;  %2193 = vperm.xlu0 %2821, %v2119_v24   ;;  %v2682_v10 = vpop.f32.mrf.mxu0  ;;  %v2129_v24 = vpop.permute.xlu1 %2128 }
 0x30f   : > { %v1466_v28 = vmax.f32 %v1462_v14, %v2682_v10 }
 0x310   : > { %v1431_v19 = vpop.f32.mrf.mxu0 }
 0x311   : > { %v1464_v30 = vmax.f32 %v1460_v20, %v1431_v19  ;;  %v2134_v13 = vpop.permute.xlu0 %2133 }
 0x312   : > { %2198 = vperm.xlu1 %2822, %v2120_v16   ;;  %v2685_v17 = vpop.f32.mrf.mxu0  ;;  %v2139_v19 = vpop.permute.xlu1 %2138 }
 0x313   : > { %v1469_v31 = vmax.f32 %v1465_v22, %v2685_v17 }
 0x314   : > { %v1444_v29 = vpop.f32.mrf.mxu0 }
 0x315   : > { %v1467_v33 = vmax.f32 %v1463_v11, %v1444_v29  ;;  %v2144_v22 = vpop.permute.xlu0 %2143 }
 0x316   : > { %v2686_v55 = vpop.f32.mrf.mxu0  ;;  %v2149_v17 = vpop.permute.xlu1 %2148 }
 0x317   : > { %v1470_v34 = vmax.f32 %v1466_v28, %v2686_v55 }
 0x318   : > { %v1447_v35 = vpop.f32.mrf.mxu0 }
 0x319   : > { %v1472_v36 = vmax.f32 %v1469_v31, %v1470_v34  ;;  %v1468_v37 = vmax.f32 %v1464_v30, %v1447_v35  ;;  %v2154_v28 = vpop.permute.xlu0 %2153 }
 0x31a   : > { %v2709_v38 = vpop.f32.mrf.mxu0  ;;  %v2159_v30 = vpop.permute.xlu1 %2158 }
 0x31b   : > { %v1471_v40 = vmax.f32 %v1467_v33, %v1468_v37 }
 0x31c   : > { %v1714_v42 = vpop.f32.mrf.mxu0 }
 0x31d   : > { %v1473_v43 = vmax.f32 %v1471_v40, %v1472_v36  ;;  %v2164_v55 = vpop.permute.xlu0 %2163 }
 0x31e   : > { %v2710_v44 = vpop.f32.mrf.mxu0  ;;  %v2169_v32 = vpop.permute.xlu1 %2168 }
 0x31f   : > { %v1474_v46 = vrot.slane %v1473_v43, 4 }
 0x320   : > { %v1717_v47 = vpop.f32.mrf.mxu0 }
 0x321   : > { %v1475_v48 = vmax.f32 %v1473_v43, %v1474_v46  ;;  %v2174_v34 = vpop.permute.xlu0 %2173 }
 0x322   : > { %v2713_v49 = vpop.f32.mrf.mxu0  ;;  %v2179_v36 = vpop.permute.xlu1 %2178 }
 0x323   : > { %v1476_v51 = vrot.slane %v1475_v48, 2  ;;  %v1779_v4 = vmax.f32 %v2709_v38, %v2713_v49 }
 0x324   : > { %v1730_v52 = vpop.f32.mrf.mxu0 }
 0x325   : > { %v1477_v53 = vmax.f32 %v1475_v48, %v1476_v51  ;;  %v1777_v5 = vmax.f32 %v1714_v42, %v1730_v52  ;;  %v2184_v38 = vpop.permute.xlu0 %2183 }
 0x326   : > { %v2714_v54 = vpop.f32.mrf.mxu0  ;;  %v2189_v39 = vpop.permute.xlu1 %2188 }
 0x327   : > { %v1478_v57 = vrot.slane %v1477_v53, 1  ;;  %v1780_v6 = vmax.f32 %v2710_v44, %v2714_v54 }
 0x328   : > { %v1733_v58 = vpop.f32.mrf.mxu0 }
 0x329   : > { %v1479_v59 = vmax.f32 %v1477_v53, %v1478_v57  ;;  %v1778_v7 = vmax.f32 %v1717_v47, %v1733_v58 }
 0x32a   : > { %v2717_v60 = vpop.f32.mrf.mxu0 }
 0x32b   : > { %v1480_v62 = vadd.f32 %v1479_v59, %v1321_v27  ;;  %v1783_v63 = vmax.f32 %v1779_v4, %v2717_v60 }
 0x32c   : > { %v1746_v0 = vpop.f32.mrf.mxu0 }
 0x32d   : > { %v1639_v61 = vadd.f32 %v1638_v23, %v1480_v62  ;;  %v1781_v9 = vmax.f32 %v1777_v5, %v1746_v0 }
 0x32e   : > { %v2718_v1 = vpop.f32.mrf.mxu0 }
 0x32f   : > { %v1784_v12 = vmax.f32 %v1780_v6, %v2718_v1 }
 0x330   : > { %v1749_v41 = vpop.f32.mrf.mxu0 }
 0x331   : > { %v1782_v15 = vmax.f32 %v1778_v7, %v1749_v41 }
 0x332   : > { %v2721_v2 = vpop.f32.mrf.mxu0 }
 0x333   : > { %v1787_v25 = vmax.f32 %v1783_v63, %v2721_v2 }
 0x334   : > { %v1762_v3 = vpop.f32.mrf.mxu0 }
 0x335   : > { %v1785_v26 = vmax.f32 %v1781_v9, %v1762_v3 }
 0x336   : > { %v2722_v8 = vpop.f32.mrf.mxu0 }
 0x337   : > { %v1788_v27 = vmax.f32 %v1784_v12, %v2722_v8 }
 0x338   : > { %v1765_v18 = vpop.f32.mrf.mxu0 }
 0x339   : > { %v1786_v10 = vmax.f32 %v1782_v15, %v1765_v18  ;;  %v1790_v14 = vmax.f32 %v1787_v25, %v1788_v27 }
 0x33b   : > { %v1789_v16 = vmax.f32 %v1785_v26, %v1786_v10 }
 0x33d   : > { %v1791_v20 = vmax.f32 %v1789_v16, %v1790_v14 }
 0x33f   : > { %v1792_v11 = vrot.slane %v1791_v20, 4 }
 0x341   : > { %v1793_v29 = vmax.f32 %v1791_v20, %v1792_v11 }
 0x343   : > { %v1794_v31 = vrot.slane %v1793_v29, 2 }
 0x345   : > { %v1795_v33 = vmax.f32 %v1793_v29, %v1794_v31 }
 0x347   : > { %v1796_v35 = vrot.slane %v1795_v33, 1 }
 0x349   : > { %v1797_v37 = vmax.f32 %v1795_v33, %v1796_v35 }
 0x34b   : > { %v3335_v40 = vadd.f32 %v1797_v37, %v1639_v61 }
 0x367   : > { %v2017_v42 = vpop.permute.xlu0 %2016 }
 0x368   : > { %v2090_v43 = vmul.f32 %v2017_v42, %v3335_v40 }
 0x369   : > { %v2012_v44 = vpop.permute.xlu1 %2011 }
 0x36a   : > { %v2202_v45 = vadd.f32 %v2129_v24, %v2090_v43  ;;  %v2089_v46 = vmul.f32 %v2012_v44, %v3335_v40 }
 0x36c   : > { %2218 = vst [vmem:[%s3341_s28 + $0x8] sm:$0xff] %v2202_v45  ;;  %v2201_v47 = vadd.f32 %v2124_v21, %v2089_v46 }
 0x36d   : > { %v2027_v48 = vpop.permute.xlu1 %2026 }
 0x36e   : > { %2217 = vst [vmem:[%s3341_s28] sm:$0xff] %v2201_v47  ;;  %v2092_v49 = vmul.f32 %v2027_v48, %v3335_v40 }
 0x370   : > { %v2204_v50 = vadd.f32 %v2139_v19, %v2092_v49 }
 0x371   : > { %v2032_v51 = vpop.permute.xlu0 %2031  ;;  %v2022_v52 = vpop.permute.xlu1 %2021 }
 0x372   : > { %2220 = vst [vmem:[%s3341_s28 + $0x18] sm:$0xff] %v2204_v50  ;;  %v2093_v53 = vmul.f32 %v2032_v51, %v3335_v40  ;;  %v2091_v54 = vmul.f32 %v2022_v52, %v3335_v40 }
 0x374   : > { %v2205_v56 = vadd.f32 %v2144_v22, %v2093_v53  ;;  %v2203_v57 = vadd.f32 %v2134_v13, %v2091_v54 }
 0x375   : > { %v2042_v58 = vpop.permute.xlu0 %2041  ;;  %v2037_v59 = vpop.permute.xlu1 %2036 }
 0x376   : > { %2221 = vst [vmem:[%s3341_s28 + $0x20] sm:$0xff] %v2205_v56  ;;  %2219 = vst [vmem:[%s3341_s28 + $0x10] sm:$0xff] %v2203_v57  ;;  %v2095_v60 = vmul.f32 %v2042_v58, %v3335_v40  ;;  %v2094_v23 = vmul.f32 %v2037_v59, %v3335_v40 }
 0x378   : > { %v2207_v62 = vadd.f32 %v2154_v28, %v2095_v60  ;;  %v2206_v0 = vadd.f32 %v2149_v17, %v2094_v23 }
 0x379   : > { %v2052_v61 = vpop.permute.xlu0 %2051  ;;  %v2047_v1 = vpop.permute.xlu1 %2046 }
 0x37a   : > { %2223 = vst [vmem:[%s3341_s28 + $0x30] sm:$0xff] %v2207_v62  ;;  %2222 = vst [vmem:[%s3341_s28 + $0x28] sm:$0xff] %v2206_v0  ;;  %v2097_v41 = vmul.f32 %v2052_v61, %v3335_v40  ;;  %v2096_v2 = vmul.f32 %v2047_v1, %v3335_v40 }
 0x37c   : > { %v2209_v3 = vadd.f32 %v2164_v55, %v2097_v41  ;;  %v2208_v4 = vadd.f32 %v2159_v30, %v2096_v2 }
 0x37d   : > { %v2062_v5 = vpop.permute.xlu0 %2061  ;;  %v2057_v6 = vpop.permute.xlu1 %2056 }
 0x37e   : > { %2225 = vst [vmem:[%s3341_s28 + $0x40] sm:$0xff] %v2209_v3  ;;  %2224 = vst [vmem:[%s3341_s28 + $0x38] sm:$0xff] %v2208_v4  ;;  %v2099_v7 = vmul.f32 %v2062_v5, %v3335_v40  ;;  %v2098_v8 = vmul.f32 %v2057_v6, %v3335_v40 }
 0x380   : > { %v2211_v63 = vadd.f32 %v2174_v34, %v2099_v7  ;;  %v2210_v9 = vadd.f32 %v2169_v32, %v2098_v8 }
 0x381   : > { %v2072_v12 = vpop.permute.xlu0 %2071  ;;  %v2067_v15 = vpop.permute.xlu1 %2066 }
 0x382   : > { %2227 = vst [vmem:[%s3341_s28 + $0x50] sm:$0xff] %v2211_v63  ;;  %2226 = vst [vmem:[%s3341_s28 + $0x48] sm:$0xff] %v2210_v9  ;;  %v2101_v18 = vmul.f32 %v2072_v12, %v3335_v40  ;;  %v2100_v21 = vmul.f32 %v2067_v15, %v3335_v40 }
 0x384   : > { %v2213_v24 = vadd.f32 %v2184_v38, %v2101_v18  ;;  %v2212_v25 = vadd.f32 %v2179_v36, %v2100_v21 }
 0x385   : > { %v2082_v26 = vpop.permute.xlu0 %2081  ;;  %v2077_v27 = vpop.permute.xlu1 %2076 }
 0x386   : > { %2229 = vst [vmem:[%s3341_s28 + $0x60] sm:$0xff] %v2213_v24  ;;  %2228 = vst [vmem:[%s3341_s28 + $0x58] sm:$0xff] %v2212_v25  ;;  %v2102_v10 = vmul.f32 %v2077_v27, %v3335_v40  ;;  %v2103_v13 = vmul.f32 %v2082_v26, %v3335_v40 }
 0x388   : > { %v2214_v14 = vadd.f32 %v2189_v39, %v2102_v10 }
 0x389   : > { %v2194_v16 = vpop.permute.xlu0 %2193  ;;  %v2087_v19 = vpop.permute.xlu1 %2086 }
 0x38a   : > { %2230 = vst [vmem:[%s3341_s28 + $0x68] sm:$0xff] %v2214_v14  ;;  %v2215_v20 = vadd.f32 %v2194_v16, %v2103_v13  ;;  %v2104_v22 = vmul.f32 %v2087_v19, %v3335_v40 }
 0x38c   : > { %2231 = vst [vmem:[%s3341_s28 + $0x70] sm:$0xff] %v2215_v20 }
 0x38d   : > { %v2199_v17 = vpop.permute.xlu1 %2198 }
 0x38e   : > { %v2216_v11 = vadd.f32 %v2199_v17, %v2104_v22 }
 0x390   : > { %2232 = vst [vmem:[%s3341_s28 + $0x78] sm:$0xff] %v2216_v11 }
 0x391   : > { %2852 = shalt.err (!%p2849_p3)
}
 0x392   : > { %s2853_s12 = scalar_lea.hbm %s3377_s7, 2048  ;;  %s2857_s20 = scalar_lea.hbm %s3428_s4, 4096 }
 0x393   : > { %p2854_p4 = scmp.ne.s32.totalorder %s3377_s7, %s2853_s12  ;;  %p2858_p9 = scmp.lt.s32.totalorder %s3377_s7, %s3428_s4 }
 0x394   : > { %p2859_p10 = scmp.lt.s32.totalorder %s2857_s20, %s2853_s12 }
 0x395   : > { %p2855_p7 = pnand %p2854_p4, %p2968_p5 }
 0x396   : > { %p2860_p11 = por %p2859_p10, %p2858_p9 }
 0x397   : > { %p2856_p8 = pneg %p2855_p7 }
 0x399   : > { %p2861_p12 = pnand %p2860_p11, %p2856_p8 }
 0x39b   : > { %2864 = shalt.err (!%p2861_p12)
}
 0x39c   : > { %s2903_s27 = smov 128   ;;  %s2904_s28 = smov 8  }
 0x39d   : > { %2779 = dma.vmem_to_hbm [thread:$0]  (%p2968_p5), %s3379_s30, 2048, %s3377_s7, %s3384_s8, %s2903_s27, %s2903_s27, %s2904_s28  }
 0x39e PF: > { %p2785_p13 = scmp.ge.s32.totalorder %s2899_s18, 2  ;;  %s2262_s29 = sand.u32 1, %s2887_s15  }
 0x39f   : > { %s2263_s5 = scalar_lea.sflag [#allocation3], %s2262_s29 }
 0x3a0   : > { %p2782_p0 = pnand %p2785_p13, %p2972_p6 }
 0x3a2   : > { %p2783_p1 = pneg %p2782_p0 }
 0x3a4   : > { %2882 = dma.done.wait (%p2783_p1), %s2263_s5, 2048  }
 0x3a5   : > { %2884 = vsyncadd (%p2783_p1), %s2263_s5, 4294965248  ;;  %p14_p2 = scmp.ge.s32.totalorder %s2955_s21, 4   ;;  %s3431_s15 = smov %s2891_s16 }
 0x3a6   : > { %s3432_s16 = smov %s2895_s17  ;;  %s3433_s17 = smov %s2966_s24 }
 0x3a7   : > { %s3434_s18 = smov %s2955_s21  ;;  %16 = sbr.rel (!%p14_p2) target bundleno = 3 (0x3), region = 71 }
 0x3ac   :  { %2268 = vsyncpa [#allocation3], 1 }
 0x3ad   :  { %2270 = vsyncpa [#allocation3 + $0x1], 1 }

</bundles_post_ra>
